<compile_context>
chip_gen: v5e
topology: v5e:2x2
jax: 0.10.0
libtpu: 0.0.40
codegen_flags: <defaults>
</compile_context>

<pallas_src>
import jax
import jax.numpy as jnp
from jax.experimental import pallas as pl
from jax.experimental.pallas import tpu as pltpu

FEAT_DIM = 128   # cfg['feat_dim']; must be 128 for `rgbd_emb + rgbd_normalized`
EMB_DIM = 128    # pcd_emb output channels (input width of feature_encoding_layer)
C_PAD = 16       # 9 input channels padded to 16 sublanes
N_MM = 8         # stacked 128x128 1x1-conv layers (after embed, before seg head)


def _geomatch_kernel(x_ref, w0_ref, b0_ref, w_ref, b_ref, wseg_ref, bseg_ref,
                     seg_ref, feat_ref):
    """One (batch, point-tile) step of the GeoMatch per-point MLP chain.

    All activations are channels-major (C, tile_n): channels on sublanes,
    points on lanes, so outputs are stored lane-dense with no transposes.
    """
    x = x_ref[0]                                   # (16, tile_n) bf16

    def layer(h_bf16, i, relu=True):
        # (128,128) @ (128,tile_n) on the MXU, f32 accumulate, folded-BN bias.
        y = jnp.dot(w_ref[i], h_bf16, preferred_element_type=jnp.float32) + b_ref[i]
        return jnp.maximum(y, 0.0) if relu else y

    # stand-in pcd_emb: per-point embed 9(->16 padded) -> 128, relu
    emb_f32 = jnp.maximum(
        jnp.dot(w0_ref[...], x, preferred_element_type=jnp.float32) + b0_ref[...],
        0.0)                                       # (128, tile_n) f32
    emb = emb_f32.astype(jnp.bfloat16)

    # feature_encoding_layer: conv1d(128,bn)+relu x3, conv1d(feat_dim, no bias/act)
    h = emb
    for i in (0, 1, 2):
        h = layer(h, i).astype(jnp.bfloat16)
    feat_f32 = layer(h, 3, relu=False)             # rgbd_features (128, tile_n) f32

    # normalize_feature_layer: conv1d(feat_dim, bn) + relu, then residual add
    nf = layer(feat_f32.astype(jnp.bfloat16), 4)
    emb2 = (emb_f32 + nf).astype(jnp.bfloat16)     # rgbd_emb = rgbd_emb + rgbd_normalized

    # seg_layer: conv1d(128,bn)+relu x3, then a real 2-row head (no act)
    h = emb2
    for i in (5, 6, 7):
        h = layer(h, i).astype(jnp.bfloat16)
    seg = jnp.dot(wseg_ref[...], h, preferred_element_type=jnp.float32) + bseg_ref[...]

    # Already channels-major -> direct lane-dense stores, no XLU transposes.
    feat_ref[0] = feat_f32.astype(feat_ref.dtype)  # (128, tile_n)
    seg_ref[0] = seg.astype(seg_ref.dtype)         # (2, tile_n)


def _pick_tile_n(bs, npts, requested=None, min_steps=8):
    """Largest tile that keeps the grid deep enough (v7x: 2 TCs need >=4 each),
    preferring tiles that divide npts so no padding / post-call slice occurs."""
    if requested is not None:
        return requested
    cands = (2048, 1024, 512, 256, 128)
    for t in cands:                                   # no-padding candidates first
        if npts % t == 0 and bs * (npts // t) >= min_steps:
            return t
    for t in cands:                                   # relax divisibility
        if bs * pl.cdiv(npts, t) >= min_steps:
            return t
    return cands[-1]


def geomatch_forward(cld_rgb_nrm, params, mesh_features, *,
                     tile_n=None, feat_dtype=jnp.float32):
    """Eval-mode GeoMatch.forward. Returns end_points dict with seg/mesh/rgbd."""
    bs, c_in, npts = cld_rgb_nrm.shape
    assert c_in <= C_PAD

    tile_n = _pick_tile_n(bs, npts, tile_n)
    npts_pad = tile_n * pl.cdiv(npts, tile_n)

    # Input is already channels-major [bs, 9, npts]: just pad channels to 16
    # sublanes and points to a tile multiple, cast to bf16.  No transpose.
    x = cld_rgb_nrm.astype(jnp.float32)
    x = jnp.pad(x, ((0, 0), (0, C_PAD - c_in), (0, npts_pad - npts)))
    x = x.astype(jnp.bfloat16)

    w0 = params["w0"]            # (128, 16)      bf16 (cols >= 9 are zero)
    b0 = params["b0"]            # (128, 1)       f32
    w_stack = params["w_stack"]  # (8, 128, 128)  bf16
    b_stack = params["b_stack"]  # (8, 128, 1)    f32
    w_seg = params["w_seg"]      # (2, 128)       bf16
    b_seg = params["b_seg"]      # (2, 1)         f32

    grid = (bs, npts_pad // tile_n)
    seg, feat = pl.pallas_call(
        _geomatch_kernel,
        out_shape=(
            jax.ShapeDtypeStruct((bs, 2, npts_pad), jnp.float32),         # seg
            jax.ShapeDtypeStruct((bs, FEAT_DIM, npts_pad), feat_dtype),   # rgbd features
        ),
        grid_spec=pltpu.PrefetchScalarGridSpec(
            num_scalar_prefetch=0,
            grid=grid,
            in_specs=[
                pl.BlockSpec((1, C_PAD, tile_n), lambda b, n: (b, 0, n)),
                pl.BlockSpec((EMB_DIM, C_PAD), lambda b, n: (0, 0)),
                pl.BlockSpec((EMB_DIM, 1), lambda b, n: (0, 0)),
                pl.BlockSpec((N_MM, EMB_DIM, EMB_DIM), lambda b, n: (0, 0, 0)),
                pl.BlockSpec((N_MM, EMB_DIM, 1), lambda b, n: (0, 0, 0)),
                pl.BlockSpec((2, EMB_DIM), lambda b, n: (0, 0)),
                pl.BlockSpec((2, 1), lambda b, n: (0, 0)),
            ],
            out_specs=[
                pl.BlockSpec((1, 2, tile_n), lambda b, n: (b, 0, n)),
                pl.BlockSpec((1, FEAT_DIM, tile_n), lambda b, n: (b, 0, n)),
            ],
        ),
        compiler_params=pltpu.CompilerParams(
            dimension_semantics=("parallel", "parallel")),
    )(x, w0, b0, w_stack, b_stack, w_seg, b_seg)

    # Only pay for the slice copy when padding was actually needed; the tile
    # picker prefers tile sizes that divide npts so this branch is rare.
    if npts_pad != npts:
        seg = seg[:, :, :npts]
        feat = feat[:, :, :npts]

    end_points = {}
    end_points["seg"] = seg                          # [bs, 2, npts]
    end_points["mesh"] = mesh_features[None]         # [1, feat_dim, n_mesh]
    end_points["rgbd"] = feat                        # [bs, feat_dim, npts]
    return end_points


def init_params(key, n_mesh=64):
    """Deterministic synthetic parameters with eval-mode BatchNorm folded in.

    Weights are kept in the natural PyTorch conv1d layout (cout, cin)."""
    keys = iter(jax.random.split(key, 64))

    def conv_t(cin, cout, bias=True):
        w = jax.random.normal(next(keys), (cout, cin), jnp.float32) / jnp.sqrt(float(cin))
        b = (0.01 * jax.random.normal(next(keys), (cout,), jnp.float32)
             if bias else jnp.zeros((cout,), jnp.float32))
        return w, b

    def bn(c):
        gamma = 1.0 + 0.01 * jax.random.normal(next(keys), (c,), jnp.float32)
        beta = 0.01 * jax.random.normal(next(keys), (c,), jnp.float32)
        mean = 0.01 * jax.random.normal(next(keys), (c,), jnp.float32)
        var = jnp.abs(1.0 + 0.01 * jax.random.normal(next(keys), (c,), jnp.float32))
        return gamma, beta, mean, var

    def fold(w, b, bn_params, eps=1e-5):
        gamma, beta, mean, var = bn_params
        scale = gamma / jnp.sqrt(var + eps)
        return w * scale[:, None], (b - mean) * scale + beta

    # layer 0: stand-in PcdEmbModel per-point embed 9 -> 128 (cols padded to 16)
    w0, b0 = conv_t(9, EMB_DIM)
    w0 = jnp.pad(w0, ((0, 0), (0, C_PAD - 9)))

    ws, bs_ = [], []

    # feature_encoding_layer: 128->128 (bn, relu) x3, then 128->feat_dim (no bias/act)
    for _ in range(3):
        w, b = conv_t(EMB_DIM, 128)
        w, b = fold(w, b, bn(128))
        ws.append(w); bs_.append(b)
    w, b = conv_t(128, FEAT_DIM, bias=False)
    ws.append(w); bs_.append(b)

    # normalize_feature_layer: feat_dim -> feat_dim, bn, relu
    w, b = conv_t(FEAT_DIM, FEAT_DIM)
    w, b = fold(w, b, bn(FEAT_DIM))
    ws.append(w); bs_.append(b)

    # seg_layer hidden: feat_dim->128 (bn, relu) x3
    cin = FEAT_DIM
    for _ in range(3):
        w, b = conv_t(cin, 128)
        w, b = fold(w, b, bn(128))
        ws.append(w); bs_.append(b)
        cin = 128

    # seg head: 128 -> 2 (no activation, no bn), kept unpadded (2,128)
    w_seg, b_seg = conv_t(128, 2)

    params = {
        "w0": w0.astype(jnp.bfloat16),                               # (128, 16)
        "b0": b0[:, None].astype(jnp.float32),                       # (128, 1)
        "w_stack": jnp.stack(ws).astype(jnp.bfloat16),               # (8, 128, 128)
        "b_stack": jnp.stack(bs_)[:, :, None].astype(jnp.float32),   # (8, 128, 1)
        "w_seg": w_seg.astype(jnp.bfloat16),                         # (2, 128)
        "b_seg": b_seg[:, None].astype(jnp.float32),                 # (2, 1)
    }

    # stand-in MeshEmbModel() output: [feat_dim, n_mesh_pts]
    mesh_features = jax.random.normal(next(keys), (FEAT_DIM, n_mesh), jnp.float32)
    return params, mesh_features


if __name__ == "__main__":
    key = jax.random.PRNGKey(0)
    k_in, k_par = jax.random.split(key)

    bs, npts, n_mesh = 2, 256, 64
    cld_rgb_nrm = jax.random.normal(k_in, (bs, 9, npts), jnp.float32)  # [bs, 9, npts]
    params, mesh_features = init_params(k_par, n_mesh)

    end_points = geomatch_forward(cld_rgb_nrm, params, mesh_features)
    end_points = jax.block_until_ready(end_points)

    assert end_points["seg"].shape == (bs, 2, npts)
    assert end_points["mesh"].shape == (1, FEAT_DIM, n_mesh)
    assert end_points["rgbd"].shape == (bs, FEAT_DIM, npts)
    print("KERNEL_OK")
</pallas_src>

<mosaic_0001>
module attributes {stable_mosaic.version = 11 : i64} {
  func.func @_geomatch_kernel(%arg0: i32, %arg1: i32, %arg2: memref<1x16x128xbf16, #tpu.memory_space<vmem>>, %arg3: memref<128x16xbf16, #tpu.memory_space<vmem>>, %arg4: memref<128x1xf32, #tpu.memory_space<vmem>>, %arg5: memref<8x128x128xbf16, #tpu.memory_space<vmem>>, %arg6: memref<8x128x1xf32, #tpu.memory_space<vmem>>, %arg7: memref<2x128xbf16, #tpu.memory_space<vmem>>, %arg8: memref<2x1xf32, #tpu.memory_space<vmem>>, %arg9: memref<1x2x128xf32, #tpu.memory_space<vmem>>, %arg10: memref<1x128x128xf32, #tpu.memory_space<vmem>>) attributes {dimension_semantics = [#tpu.dimension_semantics<parallel>, #tpu.dimension_semantics<parallel>], iteration_bounds = array<i64: 2, 2>, scalar_prefetch = 0 : i64, scratch_operands = 0 : i64, tpu.core_type = #tpu.core_type<tc>, window_params = [{transform_indices = @transform_0, window_bounds = array<i64: 1, 16, 128>}, {pipeline_mode = #tpu.pipeline_mode<synchronous>, transform_indices = @transform_1, window_bounds = array<i64: 128, 16>}, {pipeline_mode = #tpu.pipeline_mode<synchronous>, transform_indices = @transform_2, window_bounds = array<i64: 128, 1>}, {pipeline_mode = #tpu.pipeline_mode<synchronous>, transform_indices = @transform_3, window_bounds = array<i64: 8, 128, 128>}, {pipeline_mode = #tpu.pipeline_mode<synchronous>, transform_indices = @transform_4, window_bounds = array<i64: 8, 128, 1>}, {pipeline_mode = #tpu.pipeline_mode<synchronous>, transform_indices = @transform_5, window_bounds = array<i64: 2, 128>}, {pipeline_mode = #tpu.pipeline_mode<synchronous>, transform_indices = @transform_6, window_bounds = array<i64: 2, 1>}, {transform_indices = @transform_7, window_bounds = array<i64: 1, 2, 128>}, {transform_indices = @transform_8, window_bounds = array<i64: 1, 128, 128>}]} {
    %c0 = arith.constant 0 : index
    %c0_0 = arith.constant 0 : index
    %c0_1 = arith.constant 0 : index
    %0 = vector.load %arg2[%c0, %c0_0, %c0_1] : memref<1x16x128xbf16, #tpu.memory_space<vmem>>, vector<1x16x128xbf16>
    %1 = vector.shape_cast %0 : vector<1x16x128xbf16> to vector<16x128xbf16>
    %c0_2 = arith.constant 0 : index
    %c0_3 = arith.constant 0 : index
    %2 = vector.load %arg3[%c0_2, %c0_3] : memref<128x16xbf16, #tpu.memory_space<vmem>>, vector<128x16xbf16>
    %cst = arith.constant dense<0.000000e+00> : vector<128x128xf32>
    %3 = tpu.matmul %2, %1, %cst {dimension_numbers = #tpu.dot_dimension_numbers<[1], [0], [0], [1], [0, 0, 1, 1], [], []>} : vector<128x16xbf16>, vector<16x128xbf16>, vector<128x128xf32> -> vector<128x128xf32>
    %c0_4 = arith.constant 0 : index
    %c0_5 = arith.constant 0 : index
    %4 = vector.load %arg4[%c0_4, %c0_5] : memref<128x1xf32, #tpu.memory_space<vmem>>, vector<128x1xf32>
    %5 = vector.broadcast %4 : vector<128x1xf32> to vector<128x128xf32>
    %6 = arith.addf %3, %5 : vector<128x128xf32>
    %cst_6 = arith.constant 0.000000e+00 : f32
    %7 = vector.broadcast %cst_6 : f32 to vector<128x128xf32>
    %8 = arith.maximumf %6, %7 : vector<128x128xf32>
    %9 = arith.truncf %8 : vector<128x128xf32> to vector<128x128xbf16>
    %c0_7 = arith.constant 0 : index
    %c0_8 = arith.constant 0 : index
    %c0_9 = arith.constant 0 : index
    %10 = vector.load %arg5[%c0_7, %c0_8, %c0_9] : memref<8x128x128xbf16, #tpu.memory_space<vmem>>, vector<1x128x128xbf16>
    %11 = vector.shape_cast %10 : vector<1x128x128xbf16> to vector<128x128xbf16>
    %cst_10 = arith.constant dense<0.000000e+00> : vector<128x128xf32>
    %12 = tpu.matmul %11, %9, %cst_10 {dimension_numbers = #tpu.dot_dimension_numbers<[1], [0], [0], [1], [0, 0, 1, 1], [], []>} : vector<128x128xbf16>, vector<128x128xbf16>, vector<128x128xf32> -> vector<128x128xf32>
    %c0_11 = arith.constant 0 : index
    %c0_12 = arith.constant 0 : index
    %c0_13 = arith.constant 0 : index
    %13 = vector.load %arg6[%c0_11, %c0_12, %c0_13] : memref<8x128x1xf32, #tpu.memory_space<vmem>>, vector<1x128x1xf32>
    %14 = vector.shape_cast %13 : vector<1x128x1xf32> to vector<128x1xf32>
    %15 = vector.broadcast %14 : vector<128x1xf32> to vector<128x128xf32>
    %16 = arith.addf %12, %15 : vector<128x128xf32>
    %cst_14 = arith.constant 0.000000e+00 : f32
    %17 = vector.broadcast %cst_14 : f32 to vector<128x128xf32>
    %18 = arith.maximumf %16, %17 : vector<128x128xf32>
    %19 = arith.truncf %18 : vector<128x128xf32> to vector<128x128xbf16>
    %c1 = arith.constant 1 : index
    %c0_15 = arith.constant 0 : index
    %c0_16 = arith.constant 0 : index
    %20 = vector.load %arg5[%c1, %c0_15, %c0_16] : memref<8x128x128xbf16, #tpu.memory_space<vmem>>, vector<1x128x128xbf16>
    %21 = vector.shape_cast %20 : vector<1x128x128xbf16> to vector<128x128xbf16>
    %cst_17 = arith.constant dense<0.000000e+00> : vector<128x128xf32>
    %22 = tpu.matmul %21, %19, %cst_17 {dimension_numbers = #tpu.dot_dimension_numbers<[1], [0], [0], [1], [0, 0, 1, 1], [], []>} : vector<128x128xbf16>, vector<128x128xbf16>, vector<128x128xf32> -> vector<128x128xf32>
    %c1_18 = arith.constant 1 : index
    %c0_19 = arith.constant 0 : index
    %c0_20 = arith.constant 0 : index
    %23 = vector.load %arg6[%c1_18, %c0_19, %c0_20] : memref<8x128x1xf32, #tpu.memory_space<vmem>>, vector<1x128x1xf32>
    %24 = vector.shape_cast %23 : vector<1x128x1xf32> to vector<128x1xf32>
    %25 = vector.broadcast %24 : vector<128x1xf32> to vector<128x128xf32>
    %26 = arith.addf %22, %25 : vector<128x128xf32>
    %cst_21 = arith.constant 0.000000e+00 : f32
    %27 = vector.broadcast %cst_21 : f32 to vector<128x128xf32>
    %28 = arith.maximumf %26, %27 : vector<128x128xf32>
    %29 = arith.truncf %28 : vector<128x128xf32> to vector<128x128xbf16>
    %c2 = arith.constant 2 : index
    %c0_22 = arith.constant 0 : index
    %c0_23 = arith.constant 0 : index
    %30 = vector.load %arg5[%c2, %c0_22, %c0_23] : memref<8x128x128xbf16, #tpu.memory_space<vmem>>, vector<1x128x128xbf16>
    %31 = vector.shape_cast %30 : vector<1x128x128xbf16> to vector<128x128xbf16>
    %cst_24 = arith.constant dense<0.000000e+00> : vector<128x128xf32>
    %32 = tpu.matmul %31, %29, %cst_24 {dimension_numbers = #tpu.dot_dimension_numbers<[1], [0], [0], [1], [0, 0, 1, 1], [], []>} : vector<128x128xbf16>, vector<128x128xbf16>, vector<128x128xf32> -> vector<128x128xf32>
    %c2_25 = arith.constant 2 : index
    %c0_26 = arith.constant 0 : index
    %c0_27 = arith.constant 0 : index
    %33 = vector.load %arg6[%c2_25, %c0_26, %c0_27] : memref<8x128x1xf32, #tpu.memory_space<vmem>>, vector<1x128x1xf32>
    %34 = vector.shape_cast %33 : vector<1x128x1xf32> to vector<128x1xf32>
    %35 = vector.broadcast %34 : vector<128x1xf32> to vector<128x128xf32>
    %36 = arith.addf %32, %35 : vector<128x128xf32>
    %cst_28 = arith.constant 0.000000e+00 : f32
    %37 = vector.broadcast %cst_28 : f32 to vector<128x128xf32>
    %38 = arith.maximumf %36, %37 : vector<128x128xf32>
    %39 = arith.truncf %38 : vector<128x128xf32> to vector<128x128xbf16>
    %c3 = arith.constant 3 : index
    %c0_29 = arith.constant 0 : index
    %c0_30 = arith.constant 0 : index
    %40 = vector.load %arg5[%c3, %c0_29, %c0_30] : memref<8x128x128xbf16, #tpu.memory_space<vmem>>, vector<1x128x128xbf16>
    %41 = vector.shape_cast %40 : vector<1x128x128xbf16> to vector<128x128xbf16>
    %cst_31 = arith.constant dense<0.000000e+00> : vector<128x128xf32>
    %42 = tpu.matmul %41, %39, %cst_31 {dimension_numbers = #tpu.dot_dimension_numbers<[1], [0], [0], [1], [0, 0, 1, 1], [], []>} : vector<128x128xbf16>, vector<128x128xbf16>, vector<128x128xf32> -> vector<128x128xf32>
    %c3_32 = arith.constant 3 : index
    %c0_33 = arith.constant 0 : index
    %c0_34 = arith.constant 0 : index
    %43 = vector.load %arg6[%c3_32, %c0_33, %c0_34] : memref<8x128x1xf32, #tpu.memory_space<vmem>>, vector<1x128x1xf32>
    %44 = vector.shape_cast %43 : vector<1x128x1xf32> to vector<128x1xf32>
    %45 = vector.broadcast %44 : vector<128x1xf32> to vector<128x128xf32>
    %46 = arith.addf %42, %45 : vector<128x128xf32>
    %47 = arith.truncf %46 : vector<128x128xf32> to vector<128x128xbf16>
    %c4 = arith.constant 4 : index
    %c0_35 = arith.constant 0 : index
    %c0_36 = arith.constant 0 : index
    %48 = vector.load %arg5[%c4, %c0_35, %c0_36] : memref<8x128x128xbf16, #tpu.memory_space<vmem>>, vector<1x128x128xbf16>
    %49 = vector.shape_cast %48 : vector<1x128x128xbf16> to vector<128x128xbf16>
    %cst_37 = arith.constant dense<0.000000e+00> : vector<128x128xf32>
    %50 = tpu.matmul %49, %47, %cst_37 {dimension_numbers = #tpu.dot_dimension_numbers<[1], [0], [0], [1], [0, 0, 1, 1], [], []>} : vector<128x128xbf16>, vector<128x128xbf16>, vector<128x128xf32> -> vector<128x128xf32>
    %c4_38 = arith.constant 4 : index
    %c0_39 = arith.constant 0 : index
    %c0_40 = arith.constant 0 : index
    %51 = vector.load %arg6[%c4_38, %c0_39, %c0_40] : memref<8x128x1xf32, #tpu.memory_space<vmem>>, vector<1x128x1xf32>
    %52 = vector.shape_cast %51 : vector<1x128x1xf32> to vector<128x1xf32>
    %53 = vector.broadcast %52 : vector<128x1xf32> to vector<128x128xf32>
    %54 = arith.addf %50, %53 : vector<128x128xf32>
    %cst_41 = arith.constant 0.000000e+00 : f32
    %55 = vector.broadcast %cst_41 : f32 to vector<128x128xf32>
    %56 = arith.maximumf %54, %55 : vector<128x128xf32>
    %57 = arith.addf %8, %56 : vector<128x128xf32>
    %58 = arith.truncf %57 : vector<128x128xf32> to vector<128x128xbf16>
    %c5 = arith.constant 5 : index
    %c0_42 = arith.constant 0 : index
    %c0_43 = arith.constant 0 : index
    %59 = vector.load %arg5[%c5, %c0_42, %c0_43] : memref<8x128x128xbf16, #tpu.memory_space<vmem>>, vector<1x128x128xbf16>
    %60 = vector.shape_cast %59 : vector<1x128x128xbf16> to vector<128x128xbf16>
    %cst_44 = arith.constant dense<0.000000e+00> : vector<128x128xf32>
    %61 = tpu.matmul %60, %58, %cst_44 {dimension_numbers = #tpu.dot_dimension_numbers<[1], [0], [0], [1], [0, 0, 1, 1], [], []>} : vector<128x128xbf16>, vector<128x128xbf16>, vector<128x128xf32> -> vector<128x128xf32>
    %c5_45 = arith.constant 5 : index
    %c0_46 = arith.constant 0 : index
    %c0_47 = arith.constant 0 : index
    %62 = vector.load %arg6[%c5_45, %c0_46, %c0_47] : memref<8x128x1xf32, #tpu.memory_space<vmem>>, vector<1x128x1xf32>
    %63 = vector.shape_cast %62 : vector<1x128x1xf32> to vector<128x1xf32>
    %64 = vector.broadcast %63 : vector<128x1xf32> to vector<128x128xf32>
    %65 = arith.addf %61, %64 : vector<128x128xf32>
    %cst_48 = arith.constant 0.000000e+00 : f32
    %66 = vector.broadcast %cst_48 : f32 to vector<128x128xf32>
    %67 = arith.maximumf %65, %66 : vector<128x128xf32>
    %68 = arith.truncf %67 : vector<128x128xf32> to vector<128x128xbf16>
    %c6 = arith.constant 6 : index
    %c0_49 = arith.constant 0 : index
    %c0_50 = arith.constant 0 : index
    %69 = vector.load %arg5[%c6, %c0_49, %c0_50] : memref<8x128x128xbf16, #tpu.memory_space<vmem>>, vector<1x128x128xbf16>
    %70 = vector.shape_cast %69 : vector<1x128x128xbf16> to vector<128x128xbf16>
    %cst_51 = arith.constant dense<0.000000e+00> : vector<128x128xf32>
    %71 = tpu.matmul %70, %68, %cst_51 {dimension_numbers = #tpu.dot_dimension_numbers<[1], [0], [0], [1], [0, 0, 1, 1], [], []>} : vector<128x128xbf16>, vector<128x128xbf16>, vector<128x128xf32> -> vector<128x128xf32>
    %c6_52 = arith.constant 6 : index
    %c0_53 = arith.constant 0 : index
    %c0_54 = arith.constant 0 : index
    %72 = vector.load %arg6[%c6_52, %c0_53, %c0_54] : memref<8x128x1xf32, #tpu.memory_space<vmem>>, vector<1x128x1xf32>
    %73 = vector.shape_cast %72 : vector<1x128x1xf32> to vector<128x1xf32>
    %74 = vector.broadcast %73 : vector<128x1xf32> to vector<128x128xf32>
    %75 = arith.addf %71, %74 : vector<128x128xf32>
    %cst_55 = arith.constant 0.000000e+00 : f32
    %76 = vector.broadcast %cst_55 : f32 to vector<128x128xf32>
    %77 = arith.maximumf %75, %76 : vector<128x128xf32>
    %78 = arith.truncf %77 : vector<128x128xf32> to vector<128x128xbf16>
    %c7 = arith.constant 7 : index
    %c0_56 = arith.constant 0 : index
    %c0_57 = arith.constant 0 : index
    %79 = vector.load %arg5[%c7, %c0_56, %c0_57] : memref<8x128x128xbf16, #tpu.memory_space<vmem>>, vector<1x128x128xbf16>
    %80 = vector.shape_cast %79 : vector<1x128x128xbf16> to vector<128x128xbf16>
    %cst_58 = arith.constant dense<0.000000e+00> : vector<128x128xf32>
    %81 = tpu.matmul %80, %78, %cst_58 {dimension_numbers = #tpu.dot_dimension_numbers<[1], [0], [0], [1], [0, 0, 1, 1], [], []>} : vector<128x128xbf16>, vector<128x128xbf16>, vector<128x128xf32> -> vector<128x128xf32>
    %c7_59 = arith.constant 7 : index
    %c0_60 = arith.constant 0 : index
    %c0_61 = arith.constant 0 : index
    %82 = vector.load %arg6[%c7_59, %c0_60, %c0_61] : memref<8x128x1xf32, #tpu.memory_space<vmem>>, vector<1x128x1xf32>
    %83 = vector.shape_cast %82 : vector<1x128x1xf32> to vector<128x1xf32>
    %84 = vector.broadcast %83 : vector<128x1xf32> to vector<128x128xf32>
    %85 = arith.addf %81, %84 : vector<128x128xf32>
    %cst_62 = arith.constant 0.000000e+00 : f32
    %86 = vector.broadcast %cst_62 : f32 to vector<128x128xf32>
    %87 = arith.maximumf %85, %86 : vector<128x128xf32>
    %88 = arith.truncf %87 : vector<128x128xf32> to vector<128x128xbf16>
    %c0_63 = arith.constant 0 : index
    %c0_64 = arith.constant 0 : index
    %89 = vector.load %arg7[%c0_63, %c0_64] : memref<2x128xbf16, #tpu.memory_space<vmem>>, vector<2x128xbf16>
    %cst_65 = arith.constant dense<0.000000e+00> : vector<2x128xf32>
    %90 = tpu.matmul %89, %88, %cst_65 {dimension_numbers = #tpu.dot_dimension_numbers<[1], [0], [0], [1], [0, 0, 1, 1], [], []>} : vector<2x128xbf16>, vector<128x128xbf16>, vector<2x128xf32> -> vector<2x128xf32>
    %c0_66 = arith.constant 0 : index
    %c0_67 = arith.constant 0 : index
    %91 = vector.load %arg8[%c0_66, %c0_67] : memref<2x1xf32, #tpu.memory_space<vmem>>, vector<2x1xf32>
    %92 = vector.broadcast %91 : vector<2x1xf32> to vector<2x128xf32>
    %93 = arith.addf %90, %92 : vector<2x128xf32>
    %c0_68 = arith.constant 0 : index
    %c0_69 = arith.constant 0 : index
    %c0_70 = arith.constant 0 : index
    %94 = vector.load %arg10[%c0_68, %c0_69, %c0_70] : memref<1x128x128xf32, #tpu.memory_space<vmem>>, vector<1x128x128xf32>
    %95 = vector.shape_cast %94 : vector<1x128x128xf32> to vector<128x128xf32>
    %96 = vector.shape_cast %46 : vector<128x128xf32> to vector<1x128x128xf32>
    tpu.vector_store %arg10[%c0_68, %c0_69, %c0_70], %96 {strides = array<i32>} : memref<1x128x128xf32, #tpu.memory_space<vmem>>, vector<1x128x128xf32>,
    %c0_71 = arith.constant 0 : index
    %c0_72 = arith.constant 0 : index
    %c0_73 = arith.constant 0 : index
    %97 = vector.load %arg9[%c0_71, %c0_72, %c0_73] : memref<1x2x128xf32, #tpu.memory_space<vmem>>, vector<1x2x128xf32>
    %98 = vector.shape_cast %97 : vector<1x2x128xf32> to vector<2x128xf32>
    %99 = vector.shape_cast %93 : vector<2x128xf32> to vector<1x2x128xf32>
    tpu.vector_store %arg9[%c0_71, %c0_72, %c0_73], %99 {strides = array<i32>} : memref<1x2x128xf32, #tpu.memory_space<vmem>>, vector<1x2x128xf32>,
    return
  }
  func.func @transform_0(%arg0: i32, %arg1: i32) -> (i32, i32, i32) {
    %c0_i32 = arith.constant 0 : i32
    %c0_i32_0 = arith.constant 0 : i32
    return %arg0, %c0_i32, %arg1 : i32, i32, i32
  }
  func.func @transform_1(%arg0: i32, %arg1: i32) -> (i32, i32) {
    %c0_i32 = arith.constant 0 : i32
    %c0_i32_0 = arith.constant 0 : i32
    %c0_i32_1 = arith.constant 0 : i32
    return %c0_i32, %c0_i32_0 : i32, i32
  }
  func.func @transform_2(%arg0: i32, %arg1: i32) -> (i32, i32) {
    %c0_i32 = arith.constant 0 : i32
    %c0_i32_0 = arith.constant 0 : i32
    %c0_i32_1 = arith.constant 0 : i32
    return %c0_i32, %c0_i32_0 : i32, i32
  }
  func.func @transform_3(%arg0: i32, %arg1: i32) -> (i32, i32, i32) {
    %c0_i32 = arith.constant 0 : i32
    %c0_i32_0 = arith.constant 0 : i32
    %c0_i32_1 = arith.constant 0 : i32
    %c0_i32_2 = arith.constant 0 : i32
    return %c0_i32, %c0_i32_0, %c0_i32_1 : i32, i32, i32
  }
  func.func @transform_4(%arg0: i32, %arg1: i32) -> (i32, i32, i32) {
    %c0_i32 = arith.constant 0 : i32
    %c0_i32_0 = arith.constant 0 : i32
    %c0_i32_1 = arith.constant 0 : i32
    %c0_i32_2 = arith.constant 0 : i32
    return %c0_i32, %c0_i32_0, %c0_i32_1 : i32, i32, i32
  }
  func.func @transform_5(%arg0: i32, %arg1: i32) -> (i32, i32) {
    %c0_i32 = arith.constant 0 : i32
    %c0_i32_0 = arith.constant 0 : i32
    %c0_i32_1 = arith.constant 0 : i32
    return %c0_i32, %c0_i32_0 : i32, i32
  }
  func.func @transform_6(%arg0: i32, %arg1: i32) -> (i32, i32) {
    %c0_i32 = arith.constant 0 : i32
    %c0_i32_0 = arith.constant 0 : i32
    %c0_i32_1 = arith.constant 0 : i32
    return %c0_i32, %c0_i32_0 : i32, i32
  }
  func.func @transform_7(%arg0: i32, %arg1: i32) -> (i32, i32, i32) {
    %c0_i32 = arith.constant 0 : i32
    %c0_i32_0 = arith.constant 0 : i32
    return %arg0, %c0_i32, %arg1 : i32, i32, i32
  }
  func.func @transform_8(%arg0: i32, %arg1: i32) -> (i32, i32, i32) {
    %c0_i32 = arith.constant 0 : i32
    %c0_i32_0 = arith.constant 0 : i32
    return %arg0, %c0_i32, %arg1 : i32, i32, i32
  }
}

</mosaic_0001>

<bundles_post_ra>
// kernel: tpu_custom_call.1
= control target key start
LH: loop header
LB: loop body
LE: loop exit
PB: predicated region body
PF: predicated region fallthrough
CT: control target
= control target key end

     0   :  { %s4619_s0 = inlined_call_operand.vmem [shape: bf16[2,16,256], index: 0, kind: input, shape index: {}]   ;;  %s4620_s1 = inlined_call_operand.vmem [shape: bf16[128,16], index: 1, kind: input, shape index: {}]   ;;  %s4621_s2 = inlined_call_operand.vmem [shape: f32[128,1], index: 2, kind: input, shape index: {}]   ;;  %s4622_s3 = inlined_call_operand.vmem [shape: bf16[8,128,128], index: 3, kind: input, shape index: {}]   ;;  %s4623_s4 = inlined_call_operand.vmem [shape: f32[8,128,1], index: 4, kind: input, shape index: {}]   ;;  %s4624_s5 = inlined_call_operand.vmem [shape: bf16[2,128], index: 5, kind: input, shape index: {}]   ;;  %s4625_s6 = inlined_call_operand.vmem [shape: f32[2,1], index: 6, kind: input, shape index: {}]   ;;  %s4626_s7 = inlined_call_operand.hbm [shape: f32[2,2,256], index: 7, kind: output, shape index: {0}]   ;;  %s4627_s8 = inlined_call_operand.hbm [shape: f32[2,128,256], index: 8, kind: output, shape index: {1}]  }
   0x1   :  { %4639 = sst [smem:[#allocation11_spill]] %s4619_s0 }
   0x2   :  { %4640 = sst [smem:[#allocation12_spill]] %s4620_s1 }
   0x3   :  { %4641 = sst [smem:[#allocation13_spill]] %s4621_s2 }
   0x4   :  { %4642 = sst [smem:[#allocation14_spill]] %s4622_s3 }
   0x5   :  { %4643 = sst [smem:[#allocation15_spill]] %s4623_s4 }
   0x6   :  { %4644 = sst [smem:[#allocation16_spill]] %s4624_s5 }
   0x7   :  { %4645 = sst [smem:[#allocation17_spill]] %s4625_s6 }
   0x8   :  { %14 = vsyncpa [#allocation4], 0 }
   0x9   :  { %16 = vsyncpa [#allocation4 + $0x1], 0 }
   0xa   :  { %17 = vsyncpa [#allocation6], 0 }
   0xb   :  { %19 = vsyncpa [#allocation6 + $0x1], 0  ;;  %s3590_s27 = smov 0   ;;  %s3592_s28 = smov 0  }
   0xc   :  { %s3594_s29 = smov 0   ;;  %s3596_s30 = smov 0  }
   0xd   :  { %s3598_s9 = smov 0   ;;  %s3600_s10 = smov 0  }
   0xe   :  { %s3602_s11 = smov 0   ;;  %s3604_s12 = smov 0  }
   0xf LB: > { %s2712_s13 = sadd.s32 4294967295, %s3539_s12   ;;  %s2713_s14 = sadd.s32 4294967294, %s3539_s12   ;;  %s3539_s12 = sphi %s3604_s12, %s25_s12   ;;  %s3535_s11 = sphi %s3602_s11, %s4675_s11   ;;  %s3531_s10 = sphi %s3600_s10, %s4674_s10   ;;  %s3527_s9 = sphi %s3598_s9, %s4673_s9   ;;  %s3523_s30 = sphi %s3596_s30, %s4672_s30   ;;  %s3519_s29 = sphi %s3594_s29, %s4671_s29   ;;  %s3515_s28 = sphi %s3592_s28, %s4670_s28   ;;  %s3511_s27 = sphi %s3590_s27, %s4669_s27  }
  0x10   : > { %s34_s15 = sadd.s32 1, %s3531_s10  ;;  %s37_s16 = sadd.s32 1, %s3535_s11 }
  0x11   : > { %p35_p0 = scmp.ge.s32.totalorder %s34_s15, 2  ;;  %p53_p1 = scmp.ne.s32.totalorder %s3519_s29, %s3515_s28 }
  0x12   : > { %p54_p2 = scmp.eq.s32.totalorder %s3539_s12, 0  ;;  %p211_p5 = scmp.eq.s32.totalorder %s2712_s13, 3 }
  0x13   : > { %s4677_s15 = smov (%p35_p0, %s34_s15), 0  ;;  %s4679_s16 = smov (!%p35_p0, %s37_s16), %s3535_s11 }
  0x14   : > { %4646 = sst [smem:[#allocation9_spill]] %s4677_s15  ;;  %s42_s17 = ssub.s32 %s3531_s10, %s4677_s15 }
  0x15   : > { %p3642_p3 = por %p54_p2, %p53_p1  ;;  %p39_p4 = scmp.ge.s32.totalorder %s4679_s16, 2 }
  0x16   : > { %p216_p6 = scmp.ne.s32.totalorder %s3515_s28, %s3511_s27  ;;  %p217_p7 = scmp.eq.s32.totalorder %s2713_s14, 3 }
  0x17   : > { %s4681_s16 = smov (%p39_p4, %s4679_s16), 0  ;;  %p3650_p8 = por %p211_p5, %p53_p1 }
  0x18   : > { %4648 = sst [smem:[#allocation10_spill]] %s4681_s16  ;;  %p3654_p9 = por %p217_p7, %p216_p6 }
  0x19   : > { %s41_s21 = ssub.s32 %s3535_s11, %s4681_s16  ;;  %s46_s23 = sadd.s32 1, %s3519_s29 }
  0x1a   : > { %s43_s22 = sor.u32 %s42_s17, %s41_s21  ;;  %p2715_p11 = scmp.ge.s32.totalorder %s3539_s12, 4 }
  0x1b   : > { %p44_p10 = scmp.eq.s32.totalorder %s43_s22, 0 }
  0x1c   : > { %279 = sbr.rel (%p2715_p11) target bundleno = 45 (0x2d), region = 40 }
  0x1d   : > { %s3662_s24 = scalar_select %p44_p10, %s3519_s29, %s46_s23  }
  0x21   : > { %282 = sbr.rel (!%p3642_p3) target bundleno = 45 (0x2d), region = 44  ;;  %s284_s25 = sand.u32 (%p3642_p3), 1, %s3519_s29  }
  0x22   : > { %s2717_s26 = sshll.u32 (%p3642_p3), %s3535_s11, 2  ;;  %s2716_s13 = sshll.u32 (%p3642_p3), %s284_s25, 3 }
  0x23   : > { %s288_s14 = sadd.s32 (%p3642_p3), %s3531_s10, %s2717_s26  ;;  %s4651_s0 = sld [smem:[#allocation11_spill]] (%p3642_p3) }
  0x24   : > { %s2718_s15 = sshll.u32 (%p3642_p3), %s288_s14, 2  ;;  %s286_s22 = scalar_lea.vmem (%p3642_p3), [#allocation2], %s2716_s13 }
  0x29   : > { %s290_s21 = scalar_lea.vmem %s4651_s0, %s2718_s15 }
  0x2a   : > { %v307_v0 = vld [vmem:[%s290_s21] sm:$0xf]  ;;  %v309_v1 = vld [vmem:[%s290_s21 + $0x8] sm:$0xf] }
  0x2b   : > { %308 = vst [vmem:[%s286_s22] sm:$0xf] %v307_v0 }
  0x2c   : > { %310 = vst [vmem:[%s286_s22 + $0x4] sm:$0xf] %v309_v1 }
  0x2d PF: > { %p2719_p12 = scmp.ge.s32.totalorder %s3539_s12, 1  ;;  %p337_p13 = scmp.lt.s32.totalorder %s3539_s12, 5 }
  0x2f   : > { %p338_p0 = pnand %p2719_p12, %p337_p13 }
  0x30   : > { %s4652_s2 = sld [smem:[#allocation13_spill]] (!%p338_p0)  ;;  %s3685_s13 = sand.u32 (!%p338_p0), 1, %s3515_s28  }
  0x31   : > { %341 = sbr.rel (%p338_p0) target bundleno = 2700 (0xa8c), region = 85  ;;  %s2720_s14 = sshll.u32 (!%p338_p0), %s3685_s13, 3 }
  0x32   : > { %s346_s17 = scalar_lea.vmem (!%p338_p0), [#allocation2], %s2720_s14  ;;  %s4653_s1 = sld [smem:[#allocation12_spill]] (!%p338_p0) }
  0x33   : > { %s4654_s4 = sld [smem:[#allocation15_spill]] (!%p338_p0)  ;;  %s2722_s16 = sshll.u32 (!%p338_p0), %s3685_s13, 7 }
  0x34   : > { %s4655_s3 = sld [smem:[#allocation14_spill]] (!%p338_p0)  ;;  %s4369_s15 = scalar_lea.vmem (!%p338_p0), [#allocation5], %s2722_s16 }
  0x35   : > { %s4656_s6 = sld [smem:[#allocation17_spill]] (!%p338_p0)  ;;  %s3251_s0 = sshll.u32 (!%p338_p0), %s3527_s9, 5 }
  0x36   : > { %v415_v2 = vld [vmem:[%s4652_s2 + $0x70] sm:$0xff]  ;;  %v413_v3 = vld [vmem:[%s4652_s2 + $0x60] sm:$0xff]  ;;  %v3541_v5 = vmov 0   ;;  %vm543_vm0 = vcmask 130048   ;;  %v414_v10 = vld [vmem:[%s4652_s2 + $0x68] sm:$0xff]  ;;  %s4666_s5 = sld [smem:[#allocation16_spill]]  ;;  %s2588_s18 = sadd.s32 %s3523_s30, %s3251_s0 }
  0x37   : > { %v411_v4 = vld [vmem:[%s4652_s2 + $0x50] sm:$0xff]  ;;  %3412 = vset.pattern.permute.xlu2 %v3541_v5  ;;  %3411 = vset.pattern.permute.xlu1 %v3541_v5  ;;  %v3255_v6 = vld [vmem:[%s346_s17] sm:$0xff]  ;;  %v416_v11 = vld [vmem:[%s4652_s2 + $0x78] sm:$0xff]  ;;  %s3252_s23 = sshll.u32 %s2588_s18, 3  ;;  %s2591_s14 = sshll.u32 %s4369_s15, 4  ;;  %s2592_s14 = int_to_ptr.vmem [resolvable:$true] %s2591_s14 }
  0x38   : > { %3410 = vset.pattern.permute.xlu0 %v3541_v5  ;;  %479 = vperm.xlu1 %3411, %v413_v3   ;;  %v3258_v7 = vld [vmem:[%s4653_s1 + $0x10] sm:$0xff]  ;;  %v3256_v9 = vld [vmem:[%s4653_s1] sm:$0xff]  ;;  %v412_v12 = vld [vmem:[%s4652_s2 + $0x58] sm:$0xff]  ;;  %s2590_s26 = scalar_lea.hbm %s4627_s8, %s3252_s23  ;;  %s3433_s0 = scalar_lea.hbm %s4627_s8, 512 }
  0x39   : > { %489 = vperm.xlu0 %3410, %v415_v2   ;;  %469 = vperm.xlu2 %3412, %v411_v4   ;;  %v3262_v8 = vld [vmem:[%s4653_s1 + $0x30] sm:$0xff]  ;;  %v410_v13 = vld [vmem:[%s4652_s2 + $0x48] sm:$0xff]  ;;  %v409_v14 = vld [vmem:[%s4652_s2 + $0x40] sm:$0xff]  ;;  %s2593_s17 = sshll.u32 %s2590_s26, 4  ;;  %s2594_s17 = int_to_ptr.hbm [resolvable:$true] %s2593_s17 }
  0x3a   : > { %3328 = vmatpush.bf16.msra.mxu2 %v3255_v6  ;;  %3329 = vmatpush.bf16.msra.mxu3 %v3255_v6  ;;  %v407_v15 = vld [vmem:[%s4652_s2 + $0x30] sm:$0xff]  ;;  %v3259_v16 = vld [vmem:[%s4653_s1 + $0x18] sm:$0xff]  ;;  %v3257_v18 = vld [vmem:[%s4653_s1 + $0x8] sm:$0xff] }
  0x3b   : > { %575 = vmatpush.bf16.msra.mxu0 %v3255_v6  ;;  %v3263_v17 = vld [vmem:[%s4653_s1 + $0x38] sm:$0xff]  ;;  %v405_v19 = vld [vmem:[%s4652_s2 + $0x20] sm:$0xff]  ;;  %v406_v21 = vld [vmem:[%s4652_s2 + $0x28] sm:$0xff] }
  0x3c   : > { %v408_v20 = vld [vmem:[%s4652_s2 + $0x38] sm:$0xff]  ;;  %v403_v23 = vld [vmem:[%s4652_s2 + $0x10] sm:$0xff]  ;;  %v401_v24 = vld [vmem:[%s4652_s2] sm:$0xff] }
  0x3d   : > { %2761 = vmatmul.msk.bf16.vlgmr.msra.gmra.mxu2 %vm543_vm0, %v3258_v7  ;;  %2765 = vmatmul.msk.bf16.vlgmr.msra.gmra.mxu3 %vm543_vm0, %v3262_v8  ;;  %v404_v22 = vld [vmem:[%s4652_s2 + $0x18] sm:$0xff]  ;;  %v3260_v25 = vld [vmem:[%s4653_s1 + $0x20] sm:$0xff]  ;;  %v671_v26 = vld [vmem:[%s4654_s4 + $0x70] sm:$0xff] }
  0x3e   : > { %2759 = vmatmul.msk.bf16.vlgmr.msra.gmra.mxu0 %vm543_vm0, %v3256_v9  ;;  %v402_v27 = vld [vmem:[%s4652_s2 + $0x8] sm:$0xff]  ;;  %v672_v28 = vld [vmem:[%s4654_s4 + $0x78] sm:$0xff]  ;;  %v669_v30 = vld [vmem:[%s4654_s4 + $0x60] sm:$0xff]  ;;  %s3427_s2 = sshra.s32 %s2594_s17, 4  ;;  %s3428_s2 = int_to_ptr.hbm [resolvable:$true] %s3427_s2 }
  0x3f   : > { %v670_v29 = vld [vmem:[%s4654_s4 + $0x68] sm:$0xff]  ;;  %v667_v31 = vld [vmem:[%s4654_s4 + $0x50] sm:$0xff]  ;;  %v665_v33 = vld [vmem:[%s4654_s4 + $0x40] sm:$0xff]  ;;  %p3434_p4 = scmp.lt.s32.totalorder %s3428_s2, %s4627_s8 }
  0x40   : > { %484 = vperm.xlu1 %3411, %v414_v10   ;;  %v3261_v32 = vld [vmem:[%s4653_s1 + $0x28] sm:$0xff]  ;;  %v668_v34 = vld [vmem:[%s4654_s4 + $0x58] sm:$0xff]  ;;  %v663_v37 = vld [vmem:[%s4654_s4 + $0x30] sm:$0xff]  ;;  %s2562_s1 = scalar_lea.sflag [#allocation6], %s3685_s13 }
  0x41   : > { %494 = vperm.xlu0 %3410, %v416_v11   ;;  %474 = vperm.xlu2 %3412, %v412_v12   ;;  %v666_v35 = vld [vmem:[%s4654_s4 + $0x48] sm:$0xff]  ;;  %v664_v36 = vld [vmem:[%s4654_s4 + $0x38] sm:$0xff]  ;;  %v661_v38 = vld [vmem:[%s4654_s4 + $0x20] sm:$0xff] }
  0x42   : > { %v659_v39 = vld [vmem:[%s4654_s4 + $0x10] sm:$0xff]  ;;  %v662_v40 = vld [vmem:[%s4654_s4 + $0x28] sm:$0xff]  ;;  %v660_v41 = vld [vmem:[%s4654_s4 + $0x18] sm:$0xff] }
  0x43   : > { %v658_v42 = vld [vmem:[%s4654_s4 + $0x8] sm:$0xff]  ;;  %v657_v43 = vld [vmem:[%s4654_s4] sm:$0xff]  ;;  %v2829_v44 = vld [vmem:[%s4654_s4 + $0xf0] sm:$0xff] }
  0x44   : > { %v2827_v45 = vld [vmem:[%s4654_s4 + $0xe0] sm:$0xff]  ;;  %v2830_v46 = vld [vmem:[%s4654_s4 + $0xf8] sm:$0xff]  ;;  %v2828_v47 = vld [vmem:[%s4654_s4 + $0xe8] sm:$0xff] }
  0x45   : > { %v2826_v48 = vld [vmem:[%s4654_s4 + $0xd8] sm:$0xff]  ;;  %v2825_v49 = vld [vmem:[%s4654_s4 + $0xd0] sm:$0xff]  ;;  %v2823_v50 = vld [vmem:[%s4654_s4 + $0xc0] sm:$0xff] }
  0x46   : > { %v2821_v51 = vld [vmem:[%s4654_s4 + $0xb0] sm:$0xff]  ;;  %v2824_v52 = vld [vmem:[%s4654_s4 + $0xc8] sm:$0xff]  ;;  %v2822_v53 = vld [vmem:[%s4654_s4 + $0xb8] sm:$0xff] }
  0x47   : > { %v2820_v54 = vld [vmem:[%s4654_s4 + $0xa8] sm:$0xff]  ;;  %v2819_v55 = vld [vmem:[%s4654_s4 + $0xa0] sm:$0xff]  ;;  %v2817_v56 = vld [vmem:[%s4654_s4 + $0x90] sm:$0xff] }
  0x48   : > { %464 = vperm.xlu1 %3411, %v410_v13   ;;  %v2815_v57 = vld [vmem:[%s4654_s4 + $0x80] sm:$0xff]  ;;  %v2818_v58 = vld [vmem:[%s4654_s4 + $0x98] sm:$0xff]  ;;  %v2816_v59 = vld [vmem:[%s4654_s4 + $0x88] sm:$0xff] }
  0x49   : > { %459 = vperm.xlu0 %3410, %v409_v14   ;;  %449 = vperm.xlu2 %3412, %v407_v15   ;;  %v2894_v60 = vld [vmem:[%s4654_s4 + $0x178] sm:$0xff]  ;;  %v2893_v61 = vld [vmem:[%s4654_s4 + $0x170] sm:$0xff]  ;;  %v2891_v62 = vld [vmem:[%s4654_s4 + $0x160] sm:$0xff] }
  0x4a   : > { %v2889_v63 = vld [vmem:[%s4654_s4 + $0x150] sm:$0xff]  ;;  %v2892_v0 = vld [vmem:[%s4654_s4 + $0x168] sm:$0xff]  ;;  %v2890_v1 = vld [vmem:[%s4654_s4 + $0x158] sm:$0xff] }
  0x4b   : > { %v2888_v4 = vld [vmem:[%s4654_s4 + $0x148] sm:$0xff]  ;;  %v2887_v5 = vld [vmem:[%s4654_s4 + $0x140] sm:$0xff]  ;;  %v2885_v6 = vld [vmem:[%s4654_s4 + $0x130] sm:$0xff] }
  0x4c   : > { %v2883_v9 = vld [vmem:[%s4654_s4 + $0x120] sm:$0xff]  ;;  %v2886_v12 = vld [vmem:[%s4654_s4 + $0x138] sm:$0xff]  ;;  %v2884_v13 = vld [vmem:[%s4654_s4 + $0x128] sm:$0xff] }
  0x4d   : > { %2762 = vmatmul.msk.bf16.gmra.mxu2 %vm543_vm0, %v3259_v16  ;;  %2766 = vmatmul.msk.bf16.gmra.mxu3 %vm543_vm0, %v3263_v17  ;;  %v2882_v16 = vld [vmem:[%s4654_s4 + $0x118] sm:$0xff] }
  0x4e   : > { %2760 = vmatmul.msk.bf16.gmra.mxu0 %vm543_vm0, %v3257_v18  ;;  %v2881_v18 = vld [vmem:[%s4654_s4 + $0x110] sm:$0xff] }
  0x50   : > { %439 = vperm.xlu1 %3411, %v405_v19   ;;  %v2879_v19 = vld [vmem:[%s4654_s4 + $0x100] sm:$0xff] }
  0x51   : > { %454 = vperm.xlu0 %3410, %v408_v20   ;;  %444 = vperm.xlu2 %3412, %v406_v21  }
  0x58   : > { %434 = vperm.xlu1 %3411, %v404_v22  }
  0x59   : > { %429 = vperm.xlu0 %3410, %v403_v23   ;;  %419 = vperm.xlu2 %3412, %v401_v24  }
  0x5d   : > { %2763 = vmatmul.msk.bf16.gmra.mxu2 %vm543_vm0, %v3260_v25 }
  0x60   : > { %745 = vperm.xlu1 %3411, %v671_v26  }
  0x61   : > { %424 = vperm.xlu0 %3410, %v402_v27   ;;  %750 = vperm.xlu2 %3412, %v672_v28  }
  0x68   : > { %740 = vperm.xlu1 %3411, %v670_v29   ;;  %v2957_v29 = vld [vmem:[%s4654_s4 + $0x1f0] sm:$0xff] }
  0x69   : > { %735 = vperm.xlu0 %3410, %v669_v30   ;;  %725 = vperm.xlu2 %3412, %v667_v31  }
  0x6d   : > { %2764 = vmatmul.msk.bf16.gmra.mxu2 %vm543_vm0, %v3261_v32  ;;  %v2880_v32 = vld [vmem:[%s4654_s4 + $0x108] sm:$0xff] }
  0x70   : > { %715 = vperm.xlu1 %3411, %v665_v33   ;;  %v2958_v33 = vld [vmem:[%s4654_s4 + $0x1f8] sm:$0xff] }
  0x71   : > { %730 = vperm.xlu0 %3410, %v668_v34   ;;  %720 = vperm.xlu2 %3412, %v666_v35  }
  0x78   : > { %710 = vperm.xlu1 %3411, %v664_v36  }
  0x79   : > { %705 = vperm.xlu0 %3410, %v663_v37   ;;  %695 = vperm.xlu2 %3412, %v661_v38  }
  0x80   : > { %685 = vperm.xlu1 %3411, %v659_v39   ;;  %v2956_v39 = vld [vmem:[%s4654_s4 + $0x1e8] sm:$0xff] }
  0x81   : > { %700 = vperm.xlu0 %3410, %v662_v40   ;;  %690 = vperm.xlu2 %3412, %v660_v41   ;;  %v2955_v40 = vld [vmem:[%s4654_s4 + $0x1e0] sm:$0xff]  ;;  %v2953_v41 = vld [vmem:[%s4654_s4 + $0x1d0] sm:$0xff] }
  0x88   : > { %680 = vperm.xlu1 %3411, %v658_v42  }
  0x89   : > { %675 = vperm.xlu0 %3410, %v657_v43   ;;  %980 = vperm.xlu2 %3412, %v2829_v44  }
  0x90   : > { %970 = vperm.xlu1 %3411, %v2827_v45   ;;  %v2951_v45 = vld [vmem:[%s4654_s4 + $0x1c0] sm:$0xff] }
  0x91   : > { %985 = vperm.xlu0 %3410, %v2830_v46   ;;  %975 = vperm.xlu2 %3412, %v2828_v47   ;;  %v2954_v46 = vld [vmem:[%s4654_s4 + $0x1d8] sm:$0xff]  ;;  %v2952_v47 = vld [vmem:[%s4654_s4 + $0x1c8] sm:$0xff] }
  0x93   : > { %v470_v35 = vpop.permute.xlu2 %469 }
  0x98   : > { %965 = vperm.xlu1 %3411, %v2826_v48  }
  0x99   : > { %960 = vperm.xlu0 %3410, %v2825_v49   ;;  %950 = vperm.xlu2 %3412, %v2823_v50  }
  0x9b   : > { %v475_v43 = vpop.permute.xlu2 %474 }
  0xa0   : > { %940 = vperm.xlu1 %3411, %v2821_v51  }
  0xa1   : > { %955 = vperm.xlu0 %3410, %v2824_v52   ;;  %945 = vperm.xlu2 %3412, %v2822_v53   ;;  %v2950_v53 = vld [vmem:[%s4654_s4 + $0x1b8] sm:$0xff] }
  0xa3   : > { %v450_v51 = vpop.permute.xlu2 %449 }
  0xa8   : > { %935 = vperm.xlu1 %3411, %v2820_v54   ;;  %v2949_v54 = vld [vmem:[%s4654_s4 + $0x1b0] sm:$0xff] }
  0xa9   : > { %930 = vperm.xlu0 %3410, %v2819_v55   ;;  %920 = vperm.xlu2 %3412, %v2817_v56   ;;  %v2947_v55 = vld [vmem:[%s4654_s4 + $0x1a0] sm:$0xff] }
  0xaa   : > { %v480_v11 = vpop.permute.xlu1 %479 }
  0xab   : > { %v490_v10 = vpop.permute.xlu0 %489 }
  0xb0   : > { %910 = vperm.xlu1 %3411, %v2815_v57  }
  0xb1   : > { %925 = vperm.xlu0 %3410, %v2818_v58   ;;  %915 = vperm.xlu2 %3412, %v2816_v59  }
  0xb2   : > { %v485_v21 = vpop.permute.xlu1 %484 }
  0xb3   : > { %v495_v20 = vpop.permute.xlu0 %494 }
  0xb8   : > { %1220 = vperm.xlu1 %3411, %v2894_v60  }
  0xb9   : > { %1215 = vperm.xlu0 %3410, %v2893_v61   ;;  %1205 = vperm.xlu2 %3412, %v2891_v62  }
  0xba   : > { %v465_v49 = vpop.permute.xlu1 %464 }
  0xbb   : > { %v3935_v38 = vpop.f32.mrf.mxu0  ;;  %v460_v44 = vpop.permute.xlu0 %459 }
  0xc0   : > { %1195 = vperm.xlu1 %3411, %v2889_v63   ;;  %v3873_v2 = vpop.f32.mrf.mxu2  ;;  %v607_v3 = vpop.f32.mrf.mxu3 }
  0xc1   : > { %1210 = vperm.xlu0 %3410, %v2892_v0   ;;  %1200 = vperm.xlu2 %3412, %v2890_v1   ;;  %v3908_v24 = vadd.f32 %v607_v3, %v480_v11  ;;  %v2945_v1 = vld [vmem:[%s4654_s4 + $0x190] sm:$0xff]  ;;  %v445_v3 = vpop.permute.xlu2 %444 }
  0xc2   : > { %v440_v61 = vpop.permute.xlu1 %439 }
  0xc3   : > { %v4634_v30 = vmax.f32 %v3908_v24, 0.0  ;;  %v579_v48 = vpop.f32.mrf.mxu0  ;;  %v455_v52 = vpop.permute.xlu0 %454 }
  0xc8   : > { %1190 = vperm.xlu1 %3411, %v2888_v4   ;;  %v3884_v7 = vpop.f32.mrf.mxu2  ;;  %v609_v8 = vpop.f32.mrf.mxu3 }
  0xc9   : > { %1185 = vperm.xlu0 %3410, %v2887_v5   ;;  %1175 = vperm.xlu2 %3412, %v2885_v6   ;;  %v3910_v25 = vadd.f32 %v609_v8, %v485_v21  ;;  %v2948_v6 = vld [vmem:[%s4654_s4 + $0x1a8] sm:$0xff]  ;;  %v2946_v8 = vld [vmem:[%s4654_s4 + $0x198] sm:$0xff] }
  0xcb   : > { %v4635_v31 = vmax.f32 %v3910_v25, 0.0  ;;  %v582_v57 = vpop.f32.mrf.mxu0 }
  0xcd   : > { %v639_v37 = vpack.c.bf16 %v4635_v31, %v4634_v30 }
  0xd0   : > { %1165 = vperm.xlu1 %3411, %v2883_v9   ;;  %v3895_v14 = vpop.f32.mrf.mxu2  ;;  %v612_v15 = vpop.f32.mrf.mxu3 }
  0xd1   : > { %1180 = vperm.xlu0 %3410, %v2886_v12   ;;  %1170 = vperm.xlu2 %3412, %v2884_v13   ;;  %v3900_v17 = vadd.f32 %v612_v15, %v490_v10  ;;  %v430_v10 = vpop.permute.xlu0 %429  ;;  %v3991_v11 = vadd.f32 %v3895_v14, %v450_v51  ;;  %v3995_v13 = vadd.f32 %v3884_v7, %v445_v3  ;;  %v2944_v7 = vld [vmem:[%s4654_s4 + $0x188] sm:$0xff]  ;;  %v3015_v51 = vld [vmem:[%s4654_s4 + $0x240] sm:$0xff]  ;;  %v3010_v3 = vld [vmem:[%s4654_s4 + $0x218] sm:$0xff] }
  0xd2   : > { %v4003_v14 = vadd.f32 %v3873_v2, %v440_v61  ;;  %v3021_v2 = vld [vmem:[%s4654_s4 + $0x270] sm:$0xff] }
  0xd3   : > { %v4637_v26 = vmax.f32 %v3900_v17, 0.0  ;;  %v622_v21 = vmax.f32 %v3995_v13, 0.0  ;;  %v3009_v61 = vld [vmem:[%s4654_s4 + $0x210] sm:$0xff] }
  0xd8   : > { %1160 = vperm.xlu1 %3411, %v2882_v16   ;;  %v594_v22 = vpop.f32.mrf.mxu2  ;;  %v614_v23 = vpop.f32.mrf.mxu3 }
  0xd9   : > { %1155 = vperm.xlu0 %3410, %v2881_v18   ;;  %1145 = vperm.xlu2 %3412, %v2879_v19   ;;  %v3913_v27 = vadd.f32 %v614_v23, %v495_v20  ;;  %v3977_v4 = vadd.f32 %v594_v22, %v455_v52  ;;  %v584_v18 = vpop.f32.mrf.mxu0  ;;  %v623_v19 = vmax.f32 %v3991_v11, 0.0  ;;  %v435_v20 = vpop.permute.xlu1 %434  ;;  %v4010_v22 = vadd.f32 %v582_v57, %v430_v10  ;;  %v3013_v52 = vld [vmem:[%s4654_s4 + $0x230] sm:$0xff]  ;;  %v3012_v57 = vld [vmem:[%s4654_s4 + $0x228] sm:$0xff] }
  0xda   : > { %v4012_v23 = vadd.f32 %v584_v18, %v435_v20  ;;  %v3085_v10 = vld [vmem:[%s4654_s4 + $0x2f0] sm:$0xff]  ;;  %v3084_v20 = vld [vmem:[%s4654_s4 + $0x2e8] sm:$0xff] }
  0xdb   : > { %v4636_v28 = vmax.f32 %v3913_v27, 0.0  ;;  %v4638_v15 = vmax.f32 %v3977_v4, 0.0  ;;  %v3081_v18 = vld [vmem:[%s4654_s4 + $0x2d0] sm:$0xff] }
  0xdd   : > { %v640_v34 = vpack.c.bf16 %v4636_v28, %v4637_v26 }
  0xdf   : > { %801 = vmatpush.bf16.msra.mxu1 %v640_v34  ;;  %v621_v34 = vmax.f32 %v4003_v14, 0.0 }
  0xe0   : > { %1450 = vperm.xlu1 %3411, %v2957_v29   ;;  %v597_v36 = vpop.f32.mrf.mxu2  ;;  %v2943_v29 = vld [vmem:[%s4654_s4 + $0x180] sm:$0xff] }
  0xe1   : > { %1150 = vperm.xlu0 %3410, %v2880_v32   ;;  %1455 = vperm.xlu2 %3412, %v2958_v33   ;;  %v3970_v62 = vadd.f32 %v597_v36, %v460_v44  ;;  %v636_v32 = vpack.c.bf16 %v4638_v15, %v623_v19  ;;  %v420_v33 = vpop.permute.xlu2 %419  ;;  %v425_v36 = vpop.permute.xlu0 %424  ;;  %v3022_v44 = vld [vmem:[%s4654_s4 + $0x278] sm:$0xff] }
  0xe3   : > { %802 = vmatpush.bf16.msra.mxu1 %v639_v37  ;;  %v4630_v12 = vmax.f32 %v3970_v62, 0.0  ;;  %v4028_v37 = vadd.f32 %v579_v48, %v425_v36  ;;  %v3264_v48 = vld [vmem:[%s4655_s3] sm:$0xff] }
  0xe4   : > { %v3075_v36 = vld [vmem:[%s4654_s4 + $0x2a0] sm:$0xff] }
  0xe8   : > { %1445 = vperm.xlu1 %3411, %v2956_v39   ;;  %v599_v42 = vpop.f32.mrf.mxu2  ;;  %v619_v39 = vmax.f32 %v4010_v22, 0.0 }
  0xe9   : > { %1440 = vperm.xlu0 %3410, %v2955_v40   ;;  %1430 = vperm.xlu2 %3412, %v2953_v41   ;;  %v3966_v59 = vadd.f32 %v599_v42, %v465_v49  ;;  %v620_v40 = vmax.f32 %v4012_v23, 0.0  ;;  %v635_v41 = vpack.c.bf16 %v622_v21, %v621_v34  ;;  %v3018_v49 = vld [vmem:[%s4654_s4 + $0x258] sm:$0xff] }
  0xeb   : > { %v4631_v5 = vmax.f32 %v3966_v59, 0.0 }
  0xed   : > { %v637_v16 = vpack.c.bf16 %v4631_v5, %v4630_v12 }
  0xf0   : > { %1420 = vperm.xlu1 %3411, %v2951_v45   ;;  %v602_v50 = vpop.f32.mrf.mxu2  ;;  %v3020_v45 = vld [vmem:[%s4654_s4 + $0x268] sm:$0xff] }
  0xf1   : > { %1435 = vperm.xlu0 %3410, %v2954_v46   ;;  %1425 = vperm.xlu2 %3412, %v2952_v47   ;;  %v3964_v56 = vadd.f32 %v602_v50, %v470_v35  ;;  %v4026_v35 = vadd.f32 %v3935_v38, %v420_v33  ;;  %v3019_v38 = vld [vmem:[%s4654_s4 + $0x260] sm:$0xff]  ;;  %v634_v46 = vpack.c.bf16 %v620_v40, %v619_v39  ;;  %v3017_v50 = vld [vmem:[%s4654_s4 + $0x250] sm:$0xff] }
  0xf2   : > { %v3077_v33 = vld [vmem:[%s4654_s4 + $0x2b0] sm:$0xff] }
  0xf3   : > { %v4632_v63 = vmax.f32 %v3964_v56, 0.0  ;;  %v617_v42 = vmax.f32 %v4026_v35, 0.0 }
  0xf8   : > { %1415 = vperm.xlu1 %3411, %v2950_v53   ;;  %v604_v58 = vpop.f32.mrf.mxu2  ;;  %v3016_v53 = vld [vmem:[%s4654_s4 + $0x248] sm:$0xff] }
  0xf9   : > { %1410 = vperm.xlu0 %3410, %v2949_v54   ;;  %1400 = vperm.xlu2 %3412, %v2947_v55   ;;  %v3968_v60 = vadd.f32 %v604_v58, %v475_v43  ;;  %v618_v43 = vmax.f32 %v4028_v37, 0.0  ;;  %v3014_v54 = vld [vmem:[%s4654_s4 + $0x238] sm:$0xff]  ;;  %v3265_v55 = vld [vmem:[%s4655_s3 + $0x8] sm:$0xff]  ;;  %v3011_v58 = vld [vmem:[%s4654_s4 + $0x220] sm:$0xff] }
  0xfb   : > { %v4633_v0 = vmax.f32 %v3968_v60, 0.0  ;;  %v633_v47 = vpack.c.bf16 %v618_v43, %v617_v42 }
  0xfd   : > { %v638_v9 = vpack.c.bf16 %v4633_v0, %v4632_v63 }
  0xff   : > { %803 = vmatpush.bf16.msra.mxu1 %v638_v9  ;;  %v3086_v9 = vld [vmem:[%s4654_s4 + $0x2f8] sm:$0xff] }
 0x100   : > { %1390 = vperm.xlu1 %3411, %v2945_v1   ;;  %v3007_v1 = vld [vmem:[%s4654_s4 + $0x200] sm:$0xff] }
 0x101   : > { %1405 = vperm.xlu0 %3410, %v2948_v6   ;;  %1395 = vperm.xlu2 %3412, %v2946_v8   ;;  %v3008_v6 = vld [vmem:[%s4654_s4 + $0x208] sm:$0xff]  ;;  %v3266_v8 = vld [vmem:[%s4655_s3 + $0x10] sm:$0xff] }
 0x103   : > { %804 = vmatpush.bf16.msra.mxu1 %v637_v16  ;;  %v3083_v16 = vld [vmem:[%s4654_s4 + $0x2e0] sm:$0xff] }
 0x107   : > { %805 = vmatpush.bf16.msra.mxu1 %v636_v32  ;;  %v3079_v32 = vld [vmem:[%s4654_s4 + $0x2c0] sm:$0xff] }
 0x108   : > { %1385 = vperm.xlu1 %3411, %v2944_v7   ;;  %v3082_v7 = vld [vmem:[%s4654_s4 + $0x2d8] sm:$0xff] }
 0x109   : > { %1380 = vperm.xlu0 %3410, %v2943_v29   ;;  %1669 = vperm.xlu2 %3412, %v3021_v2   ;;  %v3267_v29 = vld [vmem:[%s4655_s3 + $0x18] sm:$0xff]  ;;  %v3080_v2 = vld [vmem:[%s4654_s4 + $0x2c8] sm:$0xff] }
 0x10b   : > { %806 = vmatpush.bf16.msra.mxu1 %v635_v41  ;;  %v3078_v41 = vld [vmem:[%s4654_s4 + $0x2b8] sm:$0xff] }
 0x10f   : > { %807 = vmatpush.bf16.msra.mxu1 %v634_v46  ;;  %v3073_v46 = vld [vmem:[%s4654_s4 + $0x290] sm:$0xff] }
 0x110   : > { %1659 = vperm.xlu1 %3411, %v3019_v38   ;;  %v3076_v38 = vld [vmem:[%s4654_s4 + $0x2a8] sm:$0xff] }
 0x111   : > { %1674 = vperm.xlu0 %3410, %v3022_v44   ;;  %1664 = vperm.xlu2 %3412, %v3020_v45   ;;  %v3268_v44 = vld [vmem:[%s4655_s3 + $0x20] sm:$0xff]  ;;  %v3074_v45 = vld [vmem:[%s4654_s4 + $0x298] sm:$0xff] }
 0x113   : > { %808 = vmatpush.bf16.msra.mxu1 %v633_v47  ;;  %v3071_v47 = vld [vmem:[%s4654_s4 + $0x280] sm:$0xff] }
 0x116   : > { %809 = vmatmul.bf16.vlgmr.msra.gmra.mxu1 %v3264_v48  ;;  %v3149_v48 = vld [vmem:[%s4654_s4 + $0x370] sm:$0xff] }
 0x118   : > { %1654 = vperm.xlu1 %3411, %v3018_v49   ;;  %v3072_v49 = vld [vmem:[%s4654_s4 + $0x288] sm:$0xff] }
 0x119   : > { %1649 = vperm.xlu0 %3410, %v3017_v50   ;;  %1639 = vperm.xlu2 %3412, %v3015_v51   ;;  %v3150_v50 = vld [vmem:[%s4654_s4 + $0x378] sm:$0xff]  ;;  %v3269_v51 = vld [vmem:[%s4655_s3 + $0x28] sm:$0xff] }
 0x120   : > { %1629 = vperm.xlu1 %3411, %v3013_v52   ;;  %v3148_v52 = vld [vmem:[%s4654_s4 + $0x368] sm:$0xff] }
 0x121   : > { %1644 = vperm.xlu0 %3410, %v3016_v53   ;;  %1634 = vperm.xlu2 %3412, %v3014_v54   ;;  %v3147_v53 = vld [vmem:[%s4654_s4 + $0x360] sm:$0xff]  ;;  %v3145_v54 = vld [vmem:[%s4654_s4 + $0x350] sm:$0xff] }
 0x126   : > { %814 = vmatmul.bf16.gmra.mxu1 %v3265_v55  ;;  %v3143_v55 = vld [vmem:[%s4654_s4 + $0x340] sm:$0xff] }
 0x128   : > { %1624 = vperm.xlu1 %3411, %v3012_v57   ;;  %v3146_v57 = vld [vmem:[%s4654_s4 + $0x358] sm:$0xff] }
 0x129   : > { %1619 = vperm.xlu0 %3410, %v3011_v58   ;;  %1609 = vperm.xlu2 %3412, %v3009_v61   ;;  %v3144_v58 = vld [vmem:[%s4654_s4 + $0x348] sm:$0xff]  ;;  %v3270_v61 = vld [vmem:[%s4655_s3 + $0x30] sm:$0xff] }
 0x130   : > { %1599 = vperm.xlu1 %3411, %v3007_v1   ;;  %v3142_v1 = vld [vmem:[%s4654_s4 + $0x338] sm:$0xff] }
 0x131   : > { %1614 = vperm.xlu0 %3410, %v3010_v3   ;;  %1604 = vperm.xlu2 %3412, %v3008_v6   ;;  %v3141_v3 = vld [vmem:[%s4654_s4 + $0x330] sm:$0xff]  ;;  %v3139_v6 = vld [vmem:[%s4654_s4 + $0x320] sm:$0xff] }
 0x136   : > { %819 = vmatmul.bf16.gmra.mxu1 %v3266_v8  ;;  %v3137_v8 = vld [vmem:[%s4654_s4 + $0x310] sm:$0xff] }
 0x138   : > { %1925 = vperm.xlu1 %3411, %v3086_v9   ;;  %v3140_v9 = vld [vmem:[%s4654_s4 + $0x328] sm:$0xff] }
 0x139   : > { %1920 = vperm.xlu0 %3410, %v3085_v10   ;;  %1910 = vperm.xlu2 %3412, %v3083_v16   ;;  %v3138_v10 = vld [vmem:[%s4654_s4 + $0x318] sm:$0xff] }
 0x13a   : > { %v3271_v16 = vld [vmem:[%s4655_s3 + $0x38] sm:$0xff] }
 0x140   : > { %1900 = vperm.xlu1 %3411, %v3081_v18   ;;  %v3136_v18 = vld [vmem:[%s4654_s4 + $0x308] sm:$0xff] }
 0x141   : > { %1915 = vperm.xlu0 %3410, %v3084_v20   ;;  %1905 = vperm.xlu2 %3412, %v3082_v7   ;;  %v3135_v20 = vld [vmem:[%s4654_s4 + $0x300] sm:$0xff]  ;;  %v3213_v7 = vld [vmem:[%s4654_s4 + $0x3f0] sm:$0xff] }
 0x146   : > { %824 = vmatmul.bf16.gmra.mxu1 %v3267_v29  ;;  %v3211_v29 = vld [vmem:[%s4654_s4 + $0x3e0] sm:$0xff] }
 0x148   : > { %1895 = vperm.xlu1 %3411, %v3080_v2   ;;  %v3214_v2 = vld [vmem:[%s4654_s4 + $0x3f8] sm:$0xff] }
 0x149   : > { %1890 = vperm.xlu0 %3410, %v3079_v32   ;;  %1880 = vperm.xlu2 %3412, %v3077_v33   ;;  %v3212_v32 = vld [vmem:[%s4654_s4 + $0x3e8] sm:$0xff] }
 0x150   : > { %1870 = vperm.xlu1 %3411, %v3075_v36   ;;  %v3210_v36 = vld [vmem:[%s4654_s4 + $0x3d8] sm:$0xff] }
 0x151   : > { %1885 = vperm.xlu0 %3410, %v3078_v41   ;;  %1875 = vperm.xlu2 %3412, %v3076_v38   ;;  %v3209_v41 = vld [vmem:[%s4654_s4 + $0x3d0] sm:$0xff]  ;;  %v3207_v38 = vld [vmem:[%s4654_s4 + $0x3c0] sm:$0xff] }
 0x156   : > { %829 = vmatmul.bf16.gmra.mxu1 %v3268_v44 }
 0x158   : > { %1865 = vperm.xlu1 %3411, %v3074_v45   ;;  %v3205_v45 = vld [vmem:[%s4654_s4 + $0x3b0] sm:$0xff] }
 0x159   : > { %1860 = vperm.xlu0 %3410, %v3073_v46   ;;  %1850 = vperm.xlu2 %3412, %v3071_v47   ;;  %v3208_v46 = vld [vmem:[%s4654_s4 + $0x3c8] sm:$0xff]  ;;  %v3206_v47 = vld [vmem:[%s4654_s4 + $0x3b8] sm:$0xff] }
 0x160   : > { %2155 = vperm.xlu1 %3411, %v3149_v48  }
 0x161   : > { %1855 = vperm.xlu0 %3410, %v3072_v49   ;;  %2160 = vperm.xlu2 %3412, %v3150_v50   ;;  %v3204_v49 = vld [vmem:[%s4654_s4 + $0x3a8] sm:$0xff]  ;;  %v3203_v50 = vld [vmem:[%s4654_s4 + $0x3a0] sm:$0xff] }
 0x166   : > { %834 = vmatmul.bf16.gmra.mxu1 %v3269_v51  ;;  %v3201_v51 = vld [vmem:[%s4654_s4 + $0x390] sm:$0xff] }
 0x168   : > { %2150 = vperm.xlu1 %3411, %v3148_v52  }
 0x169   : > { %2145 = vperm.xlu0 %3410, %v3147_v53   ;;  %2135 = vperm.xlu2 %3412, %v3145_v54   ;;  %v3199_v53 = vld [vmem:[%s4654_s4 + $0x380] sm:$0xff]  ;;  %v3202_v54 = vld [vmem:[%s4654_s4 + $0x398] sm:$0xff] }
 0x170   : > { %2125 = vperm.xlu1 %3411, %v3143_v55   ;;  %v3200_v55 = vld [vmem:[%s4654_s4 + $0x388] sm:$0xff] }
 0x171   : > { %2140 = vperm.xlu0 %3410, %v3146_v57   ;;  %2130 = vperm.xlu2 %3412, %v3144_v58   ;;  %v2520_v58 = vld [vmem:[%s4656_s6] sm:$0x3] }
 0x176   : > { %839 = vmatmul.bf16.gmra.mxu1 %v3270_v61 }
 0x178   : > { %2120 = vperm.xlu1 %3411, %v3142_v1  }
 0x179   : > { %2115 = vperm.xlu0 %3410, %v3141_v3   ;;  %2105 = vperm.xlu2 %3412, %v3139_v6  }
 0x180   : > { %2095 = vperm.xlu1 %3411, %v3137_v8  }
 0x181   : > { %2110 = vperm.xlu0 %3410, %v3140_v9   ;;  %2100 = vperm.xlu2 %3412, %v3138_v10  }
 0x186   : > { %844 = vmatmul.bf16.gmra.mxu1 %v3271_v16  ;;  %v746_v16 = vpop.permute.xlu1 %745 }
 0x188   : > { %2090 = vperm.xlu1 %3411, %v3136_v18  }
 0x189   : > { %2085 = vperm.xlu0 %3410, %v3135_v20   ;;  %2390 = vperm.xlu2 %3412, %v3213_v7   ;;  %v751_v20 = vpop.permute.xlu2 %750 }
 0x18e   : > { %v741_v7 = vpop.permute.xlu1 %740 }
 0x190   : > { %2380 = vperm.xlu1 %3411, %v3211_v29  }
 0x191   : > { %2395 = vperm.xlu0 %3410, %v3214_v2   ;;  %2385 = vperm.xlu2 %3412, %v3212_v32   ;;  %v736_v2 = vpop.permute.xlu0 %735  ;;  %v726_v32 = vpop.permute.xlu2 %725 }
 0x193   : > { %v4223_v33 = vpop.f32.mrf.mxu1 }
 0x198   : > { %2375 = vperm.xlu1 %3411, %v3210_v36  }
 0x199   : > { %2370 = vperm.xlu0 %3410, %v3209_v41   ;;  %2360 = vperm.xlu2 %3412, %v3207_v38   ;;  %v716_v41 = vpop.permute.xlu1 %715  ;;  %v731_v38 = vpop.permute.xlu0 %730 }
 0x19b   : > { %v4234_v44 = vpop.f32.mrf.mxu1 }
 0x1a0   : > { %2350 = vperm.xlu1 %3411, %v3205_v45  }
 0x1a1   : > { %2365 = vperm.xlu0 %3410, %v3208_v46   ;;  %2355 = vperm.xlu2 %3412, %v3206_v47   ;;  %v721_v46 = vpop.permute.xlu2 %720  ;;  %v706_v63 = vpop.permute.xlu0 %705 }
 0x1a3   : > { %v4245_v48 = vpop.f32.mrf.mxu1 }
 0x1a8   : > { %2345 = vperm.xlu1 %3411, %v3204_v49  }
 0x1a9   : > { %2340 = vperm.xlu0 %3410, %v3203_v50   ;;  %2330 = vperm.xlu2 %3412, %v3201_v51   ;;  %v696_v15 = vpop.permute.xlu2 %695 }
 0x1ab   : > { %v4256_v52 = vpop.f32.mrf.mxu1 }
 0x1b0   : > { %2320 = vperm.xlu1 %3411, %v3199_v53  }
 0x1b1   : > { %2335 = vperm.xlu0 %3410, %v3202_v54   ;;  %2325 = vperm.xlu2 %3412, %v3200_v55   ;;  %v711_v55 = vpop.permute.xlu1 %710 }
 0x1b3   : > { %v820_v57 = vpop.f32.mrf.mxu1 }
 0x1b9   : > { %2523 = vperm.xlu0 %3410, %v2520_v58  }
 0x1bb   : > { %v822_v61 = vpop.f32.mrf.mxu1 }
 0x1c3   : > { %v825_v1 = vpop.f32.mrf.mxu1 }
 0x1cb   : > { %v827_v3 = vpop.f32.mrf.mxu1 }
 0x1d3   : > { %v830_v6 = vpop.f32.mrf.mxu1 }
 0x1db   : > { %v832_v8 = vpop.f32.mrf.mxu1 }
 0x1dc   : > { %v833_v31 = vadd.f32 %v832_v8, %v721_v46  ;;  %v691_v8 = vpop.permute.xlu2 %690 }
 0x1e3   : > { %v835_v9 = vpop.f32.mrf.mxu1 }
 0x1e4   : > { %v836_v0 = vadd.f32 %v835_v9, %v726_v32  ;;  %v821_v32 = vadd.f32 %v820_v57, %v696_v15 }
 0x1eb   : > { %v837_v10 = vpop.f32.mrf.mxu1 }
 0x1ec   : > { %v838_v58 = vadd.f32 %v837_v10, %v731_v38  ;;  %v701_v10 = vpop.permute.xlu0 %700 }
 0x1ed   : > { %v823_v38 = vadd.f32 %v822_v61, %v701_v10 }
 0x1ee   : > { %v861_v28 = vmax.f32 %v838_v58, 0.0 }
 0x1f3   : > { %v840_v18 = vpop.f32.mrf.mxu1 }
 0x1f4   : > { %v841_v51 = vadd.f32 %v840_v18, %v736_v2  ;;  %v826_v2 = vadd.f32 %v825_v1, %v706_v63  ;;  %v676_v61 = vpop.permute.xlu0 %675 }
 0x1f6   : > { %v862_v30 = vmax.f32 %v841_v51, 0.0  ;;  %v3277_v51 = vld [vmem:[%s4655_s3 + $0x68] sm:$0xff] }
 0x1fb   : > { %v842_v29 = vpop.f32.mrf.mxu1 }
 0x1fc   : > { %v843_v49 = vadd.f32 %v842_v29, %v741_v7  ;;  %v828_v7 = vadd.f32 %v827_v3, %v711_v55  ;;  %v686_v29 = vpop.permute.xlu1 %685 }
 0x1fe   : > { %v863_v12 = vmax.f32 %v843_v49, 0.0  ;;  %v3275_v49 = vld [vmem:[%s4655_s3 + $0x58] sm:$0xff] }
 0x200   : > { %v872_v26 = vpack.c.bf16 %v863_v12, %v862_v30  ;;  %v818_v30 = vadd.f32 %v4256_v52, %v691_v8  ;;  %v855_v12 = vmax.f32 %v823_v38, 0.0 }
 0x202   : > { %v853_v1 = vmax.f32 %v818_v30, 0.0 }
 0x203   : > { %v845_v36 = vpop.f32.mrf.mxu1 }
 0x204   : > { %v846_v45 = vadd.f32 %v845_v36, %v746_v16  ;;  %v831_v16 = vadd.f32 %v830_v6, %v716_v41  ;;  %v860_v36 = vmax.f32 %v836_v0, 0.0  ;;  %v811_v6 = vadd.f32 %v4223_v33, %v676_v61  ;;  %v3274_v33 = vld [vmem:[%s4655_s3 + $0x50] sm:$0xff] }
 0x206   : > { %v864_v53 = vmax.f32 %v846_v45, 0.0  ;;  %v871_v18 = vpack.c.bf16 %v861_v28, %v860_v36  ;;  %v858_v45 = vmax.f32 %v831_v16, 0.0  ;;  %v681_v28 = vpop.permute.xlu1 %680  ;;  %v850_v46 = vmax.f32 %v811_v6, 0.0 }
 0x207   : > { %v813_v63 = vadd.f32 %v4234_v44, %v681_v28  ;;  %v3273_v44 = vld [vmem:[%s4655_s3 + $0x48] sm:$0xff] }
 0x209   : > { %v851_v57 = vmax.f32 %v813_v63, 0.0 }
 0x20b   : > { %v847_v47 = vpop.f32.mrf.mxu1  ;;  %v866_v52 = vpack.c.bf16 %v851_v57, %v850_v46 }
 0x20c   : > { %v848_v50 = vadd.f32 %v847_v47, %v751_v20  ;;  %v859_v20 = vmax.f32 %v833_v31, 0.0  ;;  %v857_v47 = vmax.f32 %v828_v7, 0.0  ;;  %v854_v31 = vmax.f32 %v821_v32, 0.0  ;;  %v986_v32 = vpop.permute.xlu0 %985 }
 0x20e   : > { %v865_v54 = vmax.f32 %v848_v50, 0.0  ;;  %v870_v9 = vpack.c.bf16 %v859_v20, %v858_v45  ;;  %v868_v3 = vpack.c.bf16 %v855_v12, %v854_v31  ;;  %v3276_v50 = vld [vmem:[%s4655_s3 + $0x60] sm:$0xff]  ;;  %v971_v30 = vpop.permute.xlu1 %970 }
 0x210   : > { %v873_v5 = vpack.c.bf16 %v865_v54, %v864_v53  ;;  %v3278_v53 = vld [vmem:[%s4655_s3 + $0x70] sm:$0xff]  ;;  %v3279_v54 = vld [vmem:[%s4655_s3 + $0x78] sm:$0xff] }
 0x212   : > { %1036 = vmatpush.bf16.msrb.mxu2 %v873_v5  ;;  %v856_v5 = vmax.f32 %v826_v2, 0.0 }
 0x214   : > { %v869_v0 = vpack.c.bf16 %v857_v47, %v856_v5  ;;  %v981_v47 = vpop.permute.xlu2 %980  ;;  %v961_v12 = vpop.permute.xlu0 %960 }
 0x216   : > { %1037 = vmatpush.bf16.msrb.mxu2 %v872_v26  ;;  %v816_v26 = vadd.f32 %v4245_v48, %v686_v29  ;;  %v3272_v48 = vld [vmem:[%s4655_s3 + $0x40] sm:$0xff]  ;;  %v966_v31 = vpop.permute.xlu1 %965 }
 0x218   : > { %v852_v15 = vmax.f32 %v816_v26, 0.0 }
 0x21a   : > { %1038 = vmatpush.bf16.msrb.mxu2 %v871_v18  ;;  %v867_v41 = vpack.c.bf16 %v853_v1, %v852_v15 }
 0x21c   : > { %v976_v5 = vpop.permute.xlu2 %975  ;;  %v956_v63 = vpop.permute.xlu0 %955 }
 0x21e   : > { %1039 = vmatpush.bf16.msrb.mxu2 %v870_v9 }
 0x222   : > { %1040 = vmatpush.bf16.msrb.mxu2 %v869_v0 }
 0x224   : > { %v951_v26 = vpop.permute.xlu2 %950 }
 0x226   : > { %1041 = vmatpush.bf16.msrb.mxu2 %v868_v3 }
 0x22a   : > { %1042 = vmatpush.bf16.msrb.mxu2 %v867_v41 }
 0x22c   : > { %v946_v41 = vpop.permute.xlu2 %945 }
 0x22e   : > { %1043 = vmatpush.bf16.msrb.mxu2 %v866_v52 }
 0x231   : > { %1044 = vmatmul.bf16.vlgmr.msrb.gmra.mxu2 %v3272_v48 }
 0x241   : > { %1049 = vmatmul.bf16.gmra.mxu2 %v3273_v44  ;;  %v941_v44 = vpop.permute.xlu1 %940 }
 0x251   : > { %1054 = vmatmul.bf16.gmra.mxu2 %v3274_v33 }
 0x261   : > { %1059 = vmatmul.bf16.gmra.mxu2 %v3275_v49 }
 0x271   : > { %1064 = vmatmul.bf16.gmra.mxu2 %v3276_v50 }
 0x281   : > { %1069 = vmatmul.bf16.gmra.mxu2 %v3277_v51 }
 0x291   : > { %1074 = vmatmul.bf16.gmra.mxu2 %v3278_v53 }
 0x2a1   : > { %1079 = vmatmul.bf16.gmra.mxu2 %v3279_v54  ;;  %v931_v54 = vpop.permute.xlu0 %930 }
 0x2b4   : > { %v4298_v55 = vpop.f32.mrf.mxu2 }
 0x2bc   : > { %v4300_v58 = vpop.f32.mrf.mxu2 }
 0x2c4   : > { %v1050_v16 = vpop.f32.mrf.mxu2 }
 0x2cc   : > { %v1052_v36 = vpop.f32.mrf.mxu2 }
 0x2d4   : > { %v1055_v7 = vpop.f32.mrf.mxu2 }
 0x2dc   : > { %v1057_v20 = vpop.f32.mrf.mxu2 }
 0x2e4   : > { %v1060_v18 = vpop.f32.mrf.mxu2 }
 0x2ec   : > { %v1062_v29 = vpop.f32.mrf.mxu2 }
 0x2f4   : > { %v1065_v2 = vpop.f32.mrf.mxu2 }
 0x2fc   : > { %v1067_v45 = vpop.f32.mrf.mxu2 }
 0x2fd   : > { %v1068_v50 = vadd.f32 %v1067_v45, %v956_v63  ;;  %v926_v45 = vpop.permute.xlu0 %925 }
 0x2fe   : > { %v1053_v63 = vadd.f32 %v1052_v36, %v926_v45 }
 0x304   : > { %v1070_v10 = vpop.f32.mrf.mxu2 }
 0x305   : > { %v1071_v33 = vadd.f32 %v1070_v10, %v961_v12  ;;  %v1056_v12 = vadd.f32 %v1055_v7, %v931_v54 }
 0x30c   : > { %v1072_v38 = vpop.f32.mrf.mxu2 }
 0x30d   : > { %v1073_v46 = vadd.f32 %v1072_v38, %v966_v31  ;;  %v936_v38 = vpop.permute.xlu1 %935 }
 0x30e   : > { %v1058_v31 = vadd.f32 %v1057_v20, %v936_v38 }
 0x30f   : > { %v1096_v51 = vmax.f32 %v1073_v46, 0.0 }
 0x314   : > { %v1075_v9 = vpop.f32.mrf.mxu2 }
 0x315   : > { %v1076_v6 = vadd.f32 %v1075_v9, %v971_v30  ;;  %v1061_v30 = vadd.f32 %v1060_v18, %v941_v44  ;;  %v1088_v18 = vmax.f32 %v1053_v63, 0.0  ;;  %v3283_v44 = vld [vmem:[%s4655_s3 + $0x98] sm:$0xff] }
 0x317   : > { %v1097_v49 = vmax.f32 %v1076_v6, 0.0  ;;  %v1089_v6 = vmax.f32 %v1056_v12, 0.0 }
 0x31c   : > { %v1077_v8 = vpop.f32.mrf.mxu2 }
 0x31d   : > { %v1078_v3 = vadd.f32 %v1077_v8, %v976_v5  ;;  %v1063_v5 = vadd.f32 %v1062_v29, %v946_v41  ;;  %v921_v8 = vpop.permute.xlu2 %920  ;;  %v911_v41 = vpop.permute.xlu1 %910 }
 0x31e   : > { %v1046_v20 = vadd.f32 %v4298_v55, %v911_v41  ;;  %v3282_v55 = vld [vmem:[%s4655_s3 + $0x90] sm:$0xff] }
 0x31f   : > { %v1098_v52 = vmax.f32 %v1078_v3, 0.0  ;;  %v1091_v3 = vmax.f32 %v1061_v30, 0.0 }
 0x321   : > { %v1107_v53 = vpack.c.bf16 %v1098_v52, %v1097_v49  ;;  %v3285_v49 = vld [vmem:[%s4655_s3 + $0xa8] sm:$0xff] }
 0x324   : > { %v1080_v0 = vpop.f32.mrf.mxu2 }
 0x325   : > { %v1081_v28 = vadd.f32 %v1080_v0, %v981_v47  ;;  %v1066_v47 = vadd.f32 %v1065_v2, %v951_v26  ;;  %v1095_v0 = vmax.f32 %v1071_v33, 0.0  ;;  %v1051_v26 = vadd.f32 %v1050_v16, %v921_v8  ;;  %v916_v29 = vpop.permute.xlu2 %915  ;;  %v3280_v16 = vld [vmem:[%s4655_s3 + $0x80] sm:$0xff]  ;;  %v1221_v12 = vpop.permute.xlu1 %1220 }
 0x326   : > { %v3284_v33 = vld [vmem:[%s4655_s3 + $0xa0] sm:$0xff] }
 0x327   : > { %v1099_v15 = vmax.f32 %v1081_v28, 0.0  ;;  %v1106_v9 = vpack.c.bf16 %v1096_v51, %v1095_v0  ;;  %v1093_v28 = vmax.f32 %v1066_v47, 0.0  ;;  %v1087_v46 = vmax.f32 %v1051_v26, 0.0  ;;  %v3287_v51 = vld [vmem:[%s4655_s3 + $0xb8] sm:$0xff] }
 0x329   : > { %v1102_v52 = vpack.c.bf16 %v1088_v18, %v1087_v46 }
 0x32c   : > { %v1082_v1 = vpop.f32.mrf.mxu2 }
 0x32d   : > { %v1083_v61 = vadd.f32 %v1082_v1, %v986_v32  ;;  %v1094_v32 = vmax.f32 %v1068_v50, 0.0  ;;  %v1092_v1 = vmax.f32 %v1063_v5, 0.0  ;;  %v3286_v50 = vld [vmem:[%s4655_s3 + $0xb0] sm:$0xff]  ;;  %v1206_v63 = vpop.permute.xlu2 %1205 }
 0x32f   : > { %v1100_v57 = vmax.f32 %v1083_v61, 0.0  ;;  %v1105_v10 = vpack.c.bf16 %v1094_v32, %v1093_v28  ;;  %v1090_v61 = vmax.f32 %v1058_v31, 0.0  ;;  %v1104_v2 = vpack.c.bf16 %v1092_v1, %v1091_v3  ;;  %v1216_v1 = vpop.permute.xlu0 %1215 }
 0x331   : > { %v1108_v48 = vpack.c.bf16 %v1100_v57, %v1099_v15  ;;  %v1048_v15 = vadd.f32 %v4300_v58, %v916_v29  ;;  %v1103_v57 = vpack.c.bf16 %v1090_v61, %v1089_v6  ;;  %v3281_v58 = vld [vmem:[%s4655_s3 + $0x88] sm:$0xff]  ;;  %v1196_v61 = vpop.permute.xlu1 %1195 }
 0x333   : > { %1271 = vmatpush.bf16.msrb.mxu3 %v1108_v48  ;;  %v1086_v7 = vmax.f32 %v1048_v15, 0.0  ;;  %v1085_v48 = vmax.f32 %v1046_v20, 0.0 }
 0x335   : > { %v1101_v36 = vpack.c.bf16 %v1086_v7, %v1085_v48  ;;  %v1201_v6 = vpop.permute.xlu2 %1200 }
 0x337   : > { %1272 = vmatpush.bf16.msrb.mxu3 %v1107_v53  ;;  %v1211_v3 = vpop.permute.xlu0 %1210 }
 0x339   : > { %v1191_v15 = vpop.permute.xlu1 %1190 }
 0x33b   : > { %1273 = vmatpush.bf16.msrb.mxu3 %v1106_v9 }
 0x33f   : > { %1274 = vmatpush.bf16.msrb.mxu3 %v1105_v10  ;;  %v1186_v26 = vpop.permute.xlu0 %1185 }
 0x343   : > { %1275 = vmatpush.bf16.msrb.mxu3 %v1104_v2 }
 0x347   : > { %1276 = vmatpush.bf16.msrb.mxu3 %v1103_v57 }
 0x34b   : > { %1277 = vmatpush.bf16.msrb.mxu3 %v1102_v52  ;;  %v1181_v52 = vpop.permute.xlu0 %1180 }
 0x34f   : > { %1278 = vmatpush.bf16.msrb.mxu3 %v1101_v36 }
 0x352   : > { %1279 = vmatmul.bf16.vlgmr.msrb.gmra.mxu3 %v3280_v16 }
 0x362   : > { %1284 = vmatmul.bf16.gmra.mxu3 %v3281_v58  ;;  %v1176_v58 = vpop.permute.xlu2 %1175 }
 0x372   : > { %1289 = vmatmul.bf16.gmra.mxu3 %v3282_v55 }
 0x382   : > { %1294 = vmatmul.bf16.gmra.mxu3 %v3283_v44 }
 0x392   : > { %1299 = vmatmul.bf16.gmra.mxu3 %v3284_v33 }
 0x3a2   : > { %1304 = vmatmul.bf16.gmra.mxu3 %v3285_v49 }
 0x3b2   : > { %1309 = vmatmul.bf16.gmra.mxu3 %v3286_v50 }
 0x3c2   : > { %1314 = vmatmul.bf16.gmra.mxu3 %v3287_v51  ;;  %v1166_v51 = vpop.permute.xlu1 %1165 }
 0x3d5   : > { %v4328_v53 = vpop.f32.mrf.mxu3 }
 0x3dd   : > { %v4330_v54 = vpop.f32.mrf.mxu3 }
 0x3e5   : > { %v1285_v47 = vpop.f32.mrf.mxu3 }
 0x3ed   : > { %v1287_v0 = vpop.f32.mrf.mxu3 }
 0x3f5   : > { %v1290_v5 = vpop.f32.mrf.mxu3 }
 0x3fd   : > { %v1292_v32 = vpop.f32.mrf.mxu3 }
 0x405   : > { %v1295_v9 = vpop.f32.mrf.mxu3 }
 0x40d   : > { %v1297_v8 = vpop.f32.mrf.mxu3 }
 0x415   : > { %v1300_v30 = vpop.f32.mrf.mxu3 }
 0x41d   : > { %v1302_v28 = vpop.f32.mrf.mxu3 }
 0x41e   : > { %v1303_v33 = vadd.f32 %v1302_v28, %v1191_v15  ;;  %v1161_v28 = vpop.permute.xlu1 %1160 }
 0x41f   : > { %v1288_v15 = vadd.f32 %v1287_v0, %v1161_v28 }
 0x425   : > { %v1305_v38 = vpop.f32.mrf.mxu3 }
 0x426   : > { %v1306_v55 = vadd.f32 %v1305_v38, %v1196_v61  ;;  %v1291_v61 = vadd.f32 %v1290_v5, %v1166_v51 }
 0x42d   : > { %v1307_v31 = vpop.f32.mrf.mxu3 }
 0x42e   : > { %v1308_v48 = vadd.f32 %v1307_v31, %v1201_v6  ;;  %v1171_v31 = vpop.permute.xlu2 %1170 }
 0x42f   : > { %v1293_v6 = vadd.f32 %v1292_v32, %v1171_v31 }
 0x430   : > { %v1331_v49 = vmax.f32 %v1308_v48, 0.0 }
 0x435   : > { %v1310_v10 = vpop.f32.mrf.mxu3 }
 0x436   : > { %v1311_v20 = vadd.f32 %v1310_v10, %v1206_v63  ;;  %v1296_v63 = vadd.f32 %v1295_v9, %v1176_v58  ;;  %v1323_v9 = vmax.f32 %v1288_v15, 0.0  ;;  %v3291_v58 = vld [vmem:[%s4655_s3 + $0xd8] sm:$0xff] }
 0x438   : > { %v1332_v44 = vmax.f32 %v1311_v20, 0.0  ;;  %v1324_v20 = vmax.f32 %v1291_v61, 0.0 }
 0x43d   : > { %v1312_v45 = vpop.f32.mrf.mxu3 }
 0x43e   : > { %v1313_v57 = vadd.f32 %v1312_v45, %v1211_v3  ;;  %v1298_v3 = vadd.f32 %v1297_v8, %v1181_v52  ;;  %v1156_v45 = vpop.permute.xlu0 %1155  ;;  %v1146_v52 = vpop.permute.xlu2 %1145 }
 0x43f   : > { %v1281_v32 = vadd.f32 %v4328_v53, %v1146_v52  ;;  %v3290_v53 = vld [vmem:[%s4655_s3 + $0xd0] sm:$0xff] }
 0x440   : > { %v1333_v36 = vmax.f32 %v1313_v57, 0.0  ;;  %v1326_v57 = vmax.f32 %v1296_v63, 0.0 }
 0x442   : > { %v1342_v50 = vpack.c.bf16 %v1333_v36, %v1332_v44  ;;  %v3293_v44 = vld [vmem:[%s4655_s3 + $0xe8] sm:$0xff] }
 0x445   : > { %v1315_v2 = vpop.f32.mrf.mxu3 }
 0x446   : > { %v1316_v29 = vadd.f32 %v1315_v2, %v1216_v1  ;;  %v1301_v1 = vadd.f32 %v1300_v30, %v1186_v26  ;;  %v1330_v2 = vmax.f32 %v1306_v55, 0.0  ;;  %v1286_v26 = vadd.f32 %v1285_v47, %v1156_v45  ;;  %v1151_v8 = vpop.permute.xlu0 %1150  ;;  %v3288_v47 = vld [vmem:[%s4655_s3 + $0xc0] sm:$0xff] }
 0x447   : > { %v3292_v55 = vld [vmem:[%s4655_s3 + $0xe0] sm:$0xff] }
 0x448   : > { %v1334_v46 = vmax.f32 %v1316_v29, 0.0  ;;  %v1341_v10 = vpack.c.bf16 %v1331_v49, %v1330_v2  ;;  %v1328_v29 = vmax.f32 %v1301_v1, 0.0  ;;  %v1322_v48 = vmax.f32 %v1286_v26, 0.0 }
 0x44a   : > { %v1337_v36 = vpack.c.bf16 %v1323_v9, %v1322_v48 }
 0x44d   : > { %v1317_v18 = vpop.f32.mrf.mxu3 }
 0x44e   : > { %v1318_v41 = vadd.f32 %v1317_v18, %v1221_v12  ;;  %v1329_v12 = vmax.f32 %v1303_v33, 0.0  ;;  %v1327_v18 = vmax.f32 %v1298_v3, 0.0  ;;  %v4352_v33 = vpop.permute.xlu1 %1450  ;;  %v4354_v49 = vpop.permute.xlu0 %1440 }
 0x450   : > { %v1335_v7 = vmax.f32 %v1318_v41, 0.0  ;;  %v1340_v38 = vpack.c.bf16 %v1329_v12, %v1328_v29  ;;  %v1325_v41 = vmax.f32 %v1293_v6, 0.0  ;;  %v1339_v30 = vpack.c.bf16 %v1327_v18, %v1326_v57  ;;  %v3295_v12 = vld [vmem:[%s4655_s3 + $0xf8] sm:$0xff] }
 0x452   : > { %v1343_v16 = vpack.c.bf16 %v1335_v7, %v1334_v46  ;;  %v1283_v46 = vadd.f32 %v4330_v54, %v1151_v8  ;;  %v1338_v7 = vpack.c.bf16 %v1325_v41, %v1324_v20  ;;  %v3289_v54 = vld [vmem:[%s4655_s3 + $0xc8] sm:$0xff] }
 0x454   : > { %1506 = vmatpush.bf16.msrb.mxu0 %v1343_v16  ;;  %v1321_v5 = vmax.f32 %v1283_v46, 0.0  ;;  %v1320_v16 = vmax.f32 %v1281_v32, 0.0 }
 0x456   : > { %v1336_v0 = vpack.c.bf16 %v1321_v5, %v1320_v16  ;;  %v4359_v51 = vpop.permute.xlu1 %1445  ;;  %v1436_v1 = vpop.permute.xlu0 %1435 }
 0x458   : > { %1507 = vmatpush.bf16.msrb.mxu0 %v1342_v50  ;;  %v3294_v50 = vld [vmem:[%s4655_s3 + $0xf0] sm:$0xff] }
 0x45c   : > { %1508 = vmatpush.bf16.msrb.mxu0 %v1341_v10  ;;  %v4364_v10 = vpop.permute.xlu2 %1455 }
 0x45e   : > { %v1421_v2 = vpop.permute.xlu1 %1420  ;;  %v1411_v3 = vpop.permute.xlu0 %1410 }
 0x460   : > { %1509 = vmatpush.bf16.msrb.mxu0 %v1340_v38 }
 0x464   : > { %1510 = vmatpush.bf16.msrb.mxu0 %v1339_v30  ;;  %v1431_v29 = vpop.permute.xlu2 %1430 }
 0x466   : > { %v1416_v45 = vpop.permute.xlu1 %1415  ;;  %v1406_v63 = vpop.permute.xlu0 %1405 }
 0x468   : > { %1511 = vmatpush.bf16.msrb.mxu0 %v1338_v7 }
 0x46c   : > { %1512 = vmatpush.bf16.msrb.mxu0 %v1337_v36  ;;  %v1426_v61 = vpop.permute.xlu2 %1425 }
 0x46e   : > { %v1391_v31 = vpop.permute.xlu1 %1390  ;;  %v1381_v6 = vpop.permute.xlu0 %1380 }
 0x470   : > { %1513 = vmatpush.bf16.msrb.mxu0 %v1336_v0 }
 0x473   : > { %1514 = vmatmul.bf16.vlgmr.msrb.gmra.mxu0 %v3288_v47 }
 0x474   : > { %v1401_v30 = vpop.permute.xlu2 %1400 }
 0x476   : > { %v1386_v57 = vpop.permute.xlu1 %1385 }
 0x47c   : > { %v1396_v8 = vpop.permute.xlu2 %1395 }
 0x483   : > { %1519 = vmatmul.bf16.gmra.mxu0 %v3289_v54 }
 0x493   : > { %1524 = vmatmul.bf16.gmra.mxu0 %v3290_v53 }
 0x4a3   : > { %1529 = vmatmul.bf16.gmra.mxu0 %v3291_v58 }
 0x4b3   : > { %1534 = vmatmul.bf16.gmra.mxu0 %v3292_v55 }
 0x4c3   : > { %1539 = vmatmul.bf16.gmra.mxu0 %v3293_v44 }
 0x4d3   : > { %1544 = vmatmul.bf16.gmra.mxu0 %v3294_v50 }
 0x4e3   : > { %1549 = vmatmul.bf16.gmra.mxu0 %v3295_v12 }
 0x4f0   : > { %v1515_v18 = vpop.f32.mrf.mxu0 }
 0x4f1   : > { %v4367_v38 = vadd.f32 %v1515_v18, %v1381_v6 }
 0x4f3   : > { %2539 = vst [vmem:[%s4369_s15] sm:$0xff] %v4367_v38 }
 0x4f8   : > { %v1517_v28 = vpop.f32.mrf.mxu0 }
 0x4f9   : > { %v1518_v15 = vadd.f32 %v1517_v28, %v1386_v57 }
 0x4fb   : > { %2540 = vst [vmem:[%s4369_s15 + $0x8] sm:$0xff] %v1518_v15  ;;  %v1555_v41 = vpack.c.bf16 %v1518_v15, %v4367_v38 }
 0x500   : > { %v1520_v26 = vpop.f32.mrf.mxu0 }
 0x501   : > { %v1521_v20 = vadd.f32 %v1520_v26, %v1391_v31  ;;  %v3301_v26 = vld [vmem:[%s4655_s3 + $0x128] sm:$0xff] }
 0x503   : > { %2541 = vst [vmem:[%s4369_s15 + $0x10] sm:$0xff] %v1521_v20 }
 0x508   : > { %v1522_v46 = vpop.f32.mrf.mxu0 }
 0x509   : > { %v1523_v9 = vadd.f32 %v1522_v46, %v1396_v8  ;;  %v4413_v8 = vpop.permute.xlu1 %1659  ;;  %v3302_v46 = vld [vmem:[%s4655_s3 + $0x130] sm:$0xff] }
 0x50b   : > { %2542 = vst [vmem:[%s4369_s15 + $0x18] sm:$0xff] %v1523_v9  ;;  %v1556_v7 = vpack.c.bf16 %v1523_v9, %v1521_v20  ;;  %v4411_v20 = vpop.permute.xlu2 %1669 }
 0x510   : > { %v1525_v52 = vpop.f32.mrf.mxu0 }
 0x511   : > { %v1526_v32 = vadd.f32 %v1525_v52, %v1401_v30 }
 0x513   : > { %2543 = vst [vmem:[%s4369_s15 + $0x20] sm:$0xff] %v1526_v32  ;;  %v1665_v9 = vpop.permute.xlu2 %1664 }
 0x518   : > { %v1527_v48 = vpop.f32.mrf.mxu0 }
 0x519   : > { %v1528_v5 = vadd.f32 %v1527_v48, %v1406_v63  ;;  %v1675_v48 = vpop.permute.xlu0 %1674 }
 0x51b   : > { %2544 = vst [vmem:[%s4369_s15 + $0x28] sm:$0xff] %v1528_v5  ;;  %v1557_v36 = vpack.c.bf16 %v1528_v5, %v1526_v32  ;;  %v4420_v52 = vpop.permute.xlu2 %1639  ;;  %v3303_v32 = vld [vmem:[%s4655_s3 + $0x138] sm:$0xff] }
 0x520   : > { %v1530_v16 = vpop.f32.mrf.mxu0 }
 0x521   : > { %v1531_v0 = vadd.f32 %v1530_v16, %v1411_v3  ;;  %v1650_v16 = vpop.permute.xlu0 %1649 }
 0x523   : > { %2545 = vst [vmem:[%s4369_s15 + $0x30] sm:$0xff] %v1531_v0 }
 0x528   : > { %v1532_v47 = vpop.f32.mrf.mxu0 }
 0x529   : > { %v1533_v54 = vadd.f32 %v1532_v47, %v1416_v45 }
 0x52b   : > { %2546 = vst [vmem:[%s4369_s15 + $0x38] sm:$0xff] %v1533_v54  ;;  %v1558_v53 = vpack.c.bf16 %v1533_v54, %v1531_v0 }
 0x530   : > { %v1535_v58 = vpop.f32.mrf.mxu0 }
 0x531   : > { %v1536_v55 = vadd.f32 %v1535_v58, %v1421_v2 }
 0x533   : > { %2547 = vst [vmem:[%s4369_s15 + $0x40] sm:$0xff] %v1536_v55 }
 0x538   : > { %v1537_v44 = vpop.f32.mrf.mxu0 }
 0x539   : > { %v1538_v50 = vadd.f32 %v1537_v44, %v1426_v61 }
 0x53b   : > { %2548 = vst [vmem:[%s4369_s15 + $0x48] sm:$0xff] %v1538_v50  ;;  %v1559_v12 = vpack.c.bf16 %v1538_v50, %v1536_v55 }
 0x540   : > { %v1540_v63 = vpop.f32.mrf.mxu0 }
 0x541   : > { %v1541_v31 = vadd.f32 %v1540_v63, %v1431_v29 }
 0x543   : > { %2549 = vst [vmem:[%s4369_s15 + $0x50] sm:$0xff] %v1541_v31 }
 0x548   : > { %v1542_v3 = vpop.f32.mrf.mxu0 }
 0x549   : > { %v1543_v6 = vadd.f32 %v1542_v3, %v1436_v1 }
 0x54b   : > { %2550 = vst [vmem:[%s4369_s15 + $0x58] sm:$0xff] %v1543_v6  ;;  %v1560_v30 = vpack.c.bf16 %v1543_v6, %v1541_v31 }
 0x550   : > { %v1545_v45 = vpop.f32.mrf.mxu0 }
 0x551   : > { %v1546_v18 = vadd.f32 %v1545_v45, %v4354_v49  ;;  %v3296_v49 = vld [vmem:[%s4655_s3 + $0x100] sm:$0xff] }
 0x553   : > { %2551 = vst [vmem:[%s4369_s15 + $0x60] sm:$0xff] %v1546_v18 }
 0x558   : > { %v1547_v38 = vpop.f32.mrf.mxu0 }
 0x559   : > { %v1548_v2 = vadd.f32 %v1547_v38, %v4359_v51  ;;  %v3298_v51 = vld [vmem:[%s4655_s3 + $0x110] sm:$0xff] }
 0x55b   : > { %2552 = vst [vmem:[%s4369_s15 + $0x68] sm:$0xff] %v1548_v2  ;;  %v1561_v1 = vpack.c.bf16 %v1548_v2, %v1546_v18 }
 0x560   : > { %v1550_v57 = vpop.f32.mrf.mxu0 }
 0x561   : > { %v1551_v61 = vadd.f32 %v1550_v57, %v4352_v33  ;;  %v3297_v33 = vld [vmem:[%s4655_s3 + $0x108] sm:$0xff] }
 0x563   : > { %2553 = vst [vmem:[%s4369_s15 + $0x70] sm:$0xff] %v1551_v61 }
 0x568   : > { %v1552_v28 = vpop.f32.mrf.mxu0 }
 0x569   : > { %v1553_v29 = vadd.f32 %v1552_v28, %v4364_v10  ;;  %v3299_v10 = vld [vmem:[%s4655_s3 + $0x118] sm:$0xff] }
 0x56b   : > { %2554 = vst [vmem:[%s4369_s15 + $0x78] sm:$0xff] %v1553_v29  ;;  %v1562_v15 = vpack.c.bf16 %v1553_v29, %v1551_v61 }
 0x56d   : > { %1725 = vmatpush.bf16.msrb.mxu1 %v1562_v15 }
 0x571   : > { %1726 = vmatpush.bf16.msrb.mxu1 %v1561_v1 }
 0x575   : > { %1727 = vmatpush.bf16.msrb.mxu1 %v1560_v30 }
 0x579   : > { %1728 = vmatpush.bf16.msrb.mxu1 %v1559_v12 }
 0x57d   : > { %1729 = vmatpush.bf16.msrb.mxu1 %v1558_v53  ;;  %v1645_v53 = vpop.permute.xlu0 %1644 }
 0x581   : > { %1730 = vmatpush.bf16.msrb.mxu1 %v1557_v36  ;;  %v1635_v36 = vpop.permute.xlu2 %1634 }
 0x585   : > { %1731 = vmatpush.bf16.msrb.mxu1 %v1556_v7  ;;  %v4418_v7 = vpop.permute.xlu1 %1654  ;;  %v1620_v45 = vpop.permute.xlu0 %1619 }
 0x589   : > { %1732 = vmatpush.bf16.msrb.mxu1 %v1555_v41  ;;  %v3300_v41 = vld [vmem:[%s4655_s3 + $0x120] sm:$0xff]  ;;  %v1610_v47 = vpop.permute.xlu2 %1609 }
 0x58c   : > { %1733 = vmatmul.bf16.vlgmr.msrb.gmra.mxu1 %v3296_v49 }
 0x58d   : > { %v1630_v5 = vpop.permute.xlu1 %1629  ;;  %v1615_v57 = vpop.permute.xlu0 %1614 }
 0x591   : > { %v1605_v44 = vpop.permute.xlu2 %1604 }
 0x595   : > { %v1625_v0 = vpop.permute.xlu1 %1624 }
 0x59c   : > { %1738 = vmatmul.bf16.gmra.mxu1 %v3297_v33 }
 0x59d   : > { %v1600_v58 = vpop.permute.xlu1 %1599 }
 0x5ac   : > { %1743 = vmatmul.bf16.gmra.mxu1 %v3298_v51 }
 0x5bc   : > { %1748 = vmatmul.bf16.gmra.mxu1 %v3299_v10 }
 0x5cc   : > { %1753 = vmatmul.bf16.gmra.mxu1 %v3300_v41 }
 0x5dc   : > { %1758 = vmatmul.bf16.gmra.mxu1 %v3301_v26 }
 0x5ec   : > { %1763 = vmatmul.bf16.gmra.mxu1 %v3302_v46 }
 0x5fc   : > { %1768 = vmatmul.bf16.gmra.mxu1 %v3303_v32 }
 0x609   : > { %v1734_v54 = vpop.f32.mrf.mxu1 }
 0x60a   : > { %v1735_v55 = vadd.f32 %v1734_v54, %v1600_v58  ;;  %v4657_v54 = vmax.f32 %v3977_v4, 0.0 }
 0x60c   : > { %v1774_v12 = vmax.f32 %v1735_v55, 0.0 }
 0x60e   : > { %v4427_v3 = vadd.f32 %v1774_v12, %v617_v42 }
 0x611   : > { %v1736_v50 = vpop.f32.mrf.mxu1 }
 0x612   : > { %v1737_v63 = vadd.f32 %v1736_v50, %v1605_v44 }
 0x614   : > { %v1775_v31 = vmax.f32 %v1737_v63, 0.0 }
 0x616   : > { %v4431_v6 = vadd.f32 %v1775_v31, %v618_v43 }
 0x618   : > { %v1806_v18 = vpack.c.bf16 %v4431_v6, %v4427_v3  ;;  %v3308_v3 = vld [vmem:[%s4655_s3 + $0x160] sm:$0xff]  ;;  %v3309_v6 = vld [vmem:[%s4655_s3 + $0x168] sm:$0xff] }
 0x619   : > { %v1739_v38 = vpop.f32.mrf.mxu1 }
 0x61a   : > { %v1740_v2 = vadd.f32 %v1739_v38, %v1610_v47 }
 0x61c   : > { %v1776_v28 = vmax.f32 %v1740_v2, 0.0 }
 0x61e   : > { %v4437_v35 = vadd.f32 %v1776_v28, %v619_v39  ;;  %v4659_v28 = vmax.f32 %v3913_v27, 0.0 }
 0x621   : > { %v1741_v61 = vpop.f32.mrf.mxu1 }
 0x622   : > { %v1742_v29 = vadd.f32 %v1741_v61, %v1615_v57  ;;  %v4658_v57 = vmax.f32 %v3900_v17, 0.0  ;;  %v4662_v17 = vmax.f32 %v3968_v60, 0.0  ;;  %v3304_v60 = vld [vmem:[%s4655_s3 + $0x140] sm:$0xff] }
 0x624   : > { %v1777_v15 = vmax.f32 %v1742_v29, 0.0 }
 0x626   : > { %v1793_v37 = vadd.f32 %v1777_v15, %v620_v40 }
 0x628   : > { %v1807_v42 = vpack.c.bf16 %v1793_v37, %v4437_v35 }
 0x629   : > { %v1744_v43 = vpop.f32.mrf.mxu1 }
 0x62a   : > { %v1745_v1 = vadd.f32 %v1744_v43, %v1620_v45 }
 0x62c   : > { %v1778_v49 = vmax.f32 %v1745_v1, 0.0 }
 0x62e   : > { %v1794_v10 = vadd.f32 %v1778_v49, %v621_v34 }
 0x631   : > { %v1746_v30 = vpop.f32.mrf.mxu1 }
 0x632   : > { %v1747_v33 = vadd.f32 %v1746_v30, %v1625_v0 }
 0x634   : > { %v1779_v51 = vmax.f32 %v1747_v33, 0.0 }
 0x636   : > { %v1795_v41 = vadd.f32 %v1779_v51, %v622_v21 }
 0x638   : > { %v1808_v22 = vpack.c.bf16 %v1795_v41, %v1794_v10  ;;  %v1911_v41 = vpop.permute.xlu2 %1910 }
 0x639   : > { %v1749_v39 = vpop.f32.mrf.mxu1 }
 0x63a   : > { %v1750_v26 = vadd.f32 %v1749_v39, %v1630_v5 }
 0x63c   : > { %v1780_v23 = vmax.f32 %v1750_v26, 0.0  ;;  %v3311_v26 = vld [vmem:[%s4655_s3 + $0x178] sm:$0xff] }
 0x63e   : > { %v1796_v47 = vadd.f32 %v1780_v23, %v623_v19  ;;  %v1926_v23 = vpop.permute.xlu1 %1925 }
 0x640   : > { %v1906_v39 = vpop.permute.xlu2 %1905 }
 0x641   : > { %v1751_v46 = vpop.f32.mrf.mxu1 }
 0x642   : > { %v1752_v40 = vadd.f32 %v1751_v46, %v1635_v36 }
 0x644   : > { %v1781_v32 = vmax.f32 %v1752_v40, 0.0 }
 0x646   : > { %v1797_v0 = vadd.f32 %v1781_v32, %v4657_v54 }
 0x648   : > { %v1809_v58 = vpack.c.bf16 %v1797_v0, %v1796_v47  ;;  %v1881_v40 = vpop.permute.xlu2 %1880  ;;  %v1901_v47 = vpop.permute.xlu1 %1900 }
 0x649   : > { %v1754_v55 = vpop.f32.mrf.mxu1 }
 0x650   : > { %v1876_v54 = vpop.permute.xlu2 %1875 }
 0x651   : > { %v1756_v14 = vpop.f32.mrf.mxu1 }
 0x652   : > { %v1757_v15 = vadd.f32 %v1756_v14, %v1645_v53  ;;  %v4663_v53 = vmax.f32 %v3964_v56, 0.0  ;;  %v3305_v56 = vld [vmem:[%s4655_s3 + $0x148] sm:$0xff] }
 0x658   : > { %v1851_v14 = vpop.permute.xlu2 %1850 }
 0x659   : > { %v1759_v34 = vpop.f32.mrf.mxu1 }
 0x65a   : > { %v1760_v38 = vadd.f32 %v1759_v34, %v1650_v16  ;;  %v1783_v16 = vmax.f32 %v1757_v15, 0.0 }
 0x65c   : > { %v1784_v37 = vmax.f32 %v1760_v38, 0.0 }
 0x65e   : > { %v1800_v49 = vadd.f32 %v1784_v37, %v4663_v53 }
 0x661   : > { %v1761_v44 = vpop.f32.mrf.mxu1 }
 0x662   : > { %v1762_v19 = vadd.f32 %v1761_v44, %v4418_v7  ;;  %v4661_v7 = vmax.f32 %v3908_v24, 0.0 }
 0x669   : > { %v1764_v13 = vpop.f32.mrf.mxu1 }
 0x66a   : > { %v1765_v36 = vadd.f32 %v1764_v13, %v4413_v8 }
 0x66c   : > { %v1786_v2 = vmax.f32 %v1765_v36, 0.0 }
 0x66e   : > { %v1802_v43 = vadd.f32 %v1786_v2, %v4661_v7 }
 0x671   : > { %v1766_v21 = vpop.f32.mrf.mxu1 }
 0x672   : > { %v1767_v12 = vadd.f32 %v1766_v21, %v1665_v9  ;;  %v4660_v9 = vmax.f32 %v3910_v25, 0.0  ;;  %v4664_v25 = vmax.f32 %v3966_v59, 0.0  ;;  %v3306_v59 = vld [vmem:[%s4655_s3 + $0x150] sm:$0xff] }
 0x674   : > { %v1787_v4 = vmax.f32 %v1767_v12, 0.0  ;;  %v1799_v33 = vadd.f32 %v1783_v16, %v4664_v25 }
 0x676   : > { %v1803_v35 = vadd.f32 %v1787_v4, %v4660_v9 }
 0x678   : > { %v1812_v30 = vpack.c.bf16 %v1803_v35, %v1802_v43 }
 0x679   : > { %v1769_v50 = vpop.f32.mrf.mxu1 }
 0x67a   : > { %v1770_v5 = vadd.f32 %v1769_v50, %v4411_v20  ;;  %v1785_v20 = vmax.f32 %v1762_v19, 0.0 }
 0x67c   : > { %v1788_v31 = vmax.f32 %v1770_v5, 0.0  ;;  %v1801_v1 = vadd.f32 %v1785_v20, %v4662_v17 }
 0x67e   : > { %v1804_v61 = vadd.f32 %v1788_v31, %v4658_v57  ;;  %v1811_v51 = vpack.c.bf16 %v1801_v1, %v1800_v49 }
 0x681   : > { %v1771_v63 = vpop.f32.mrf.mxu1 }
 0x682   : > { %v1772_v11 = vadd.f32 %v1771_v63, %v1675_v48  ;;  %v1755_v48 = vadd.f32 %v1754_v55, %v4420_v52  ;;  %v4665_v52 = vmax.f32 %v3970_v62, 0.0  ;;  %v3307_v62 = vld [vmem:[%s4655_s3 + $0x158] sm:$0xff]  ;;  %v1896_v55 = vpop.permute.xlu1 %1895 }
 0x684   : > { %v1789_v45 = vmax.f32 %v1772_v11, 0.0  ;;  %v1782_v27 = vmax.f32 %v1755_v48, 0.0 }
 0x686   : > { %v1805_v29 = vadd.f32 %v1789_v45, %v4659_v28  ;;  %v1798_v10 = vadd.f32 %v1782_v27, %v4665_v52 }
 0x688   : > { %v1813_v8 = vpack.c.bf16 %v1805_v29, %v1804_v61  ;;  %v1810_v24 = vpack.c.bf16 %v1799_v33, %v1798_v10 }
 0x68a   : > { %1976 = vmatpush.bf16.msra.mxu2 %v1813_v8  ;;  %v1871_v63 = vpop.permute.xlu1 %1870 }
 0x68e   : > { %1977 = vmatpush.bf16.msra.mxu2 %v1812_v30 }
 0x692   : > { %1978 = vmatpush.bf16.msra.mxu2 %v1811_v51  ;;  %v1866_v11 = vpop.permute.xlu1 %1865 }
 0x696   : > { %1979 = vmatpush.bf16.msra.mxu2 %v1810_v24 }
 0x69a   : > { %1980 = vmatpush.bf16.msra.mxu2 %v1809_v58 }
 0x69e   : > { %1981 = vmatpush.bf16.msra.mxu2 %v1808_v22 }
 0x6a2   : > { %1982 = vmatpush.bf16.msra.mxu2 %v1807_v42  ;;  %v3310_v42 = vld [vmem:[%s4655_s3 + $0x170] sm:$0xff] }
 0x6a6   : > { %1983 = vmatpush.bf16.msra.mxu2 %v1806_v18  ;;  %v1921_v18 = vpop.permute.xlu0 %1920 }
 0x6a9   : > { %1984 = vmatmul.bf16.vlgmr.msra.gmra.mxu2 %v3304_v60 }
 0x6ae   : > { %v1916_v22 = vpop.permute.xlu0 %1915 }
 0x6b6   : > { %v4497_v46 = vpop.permute.xlu0 %1890 }
 0x6b9   : > { %1989 = vmatmul.bf16.gmra.mxu2 %v3305_v56 }
 0x6be   : > { %v1886_v32 = vpop.permute.xlu0 %1885 }
 0x6c6   : > { %v1861_v0 = vpop.permute.xlu0 %1860 }
 0x6c9   : > { %1994 = vmatmul.bf16.gmra.mxu2 %v3306_v59 }
 0x6ce   : > { %v1856_v44 = vpop.permute.xlu0 %1855 }
 0x6d9   : > { %1999 = vmatmul.bf16.gmra.mxu2 %v3307_v62 }
 0x6e9   : > { %2004 = vmatmul.bf16.gmra.mxu2 %v3308_v3 }
 0x6f9   : > { %2009 = vmatmul.bf16.gmra.mxu2 %v3309_v6 }
 0x709   : > { %2014 = vmatmul.bf16.gmra.mxu2 %v3310_v42 }
 0x719   : > { %2019 = vmatmul.bf16.gmra.mxu2 %v3311_v26 }
 0x72c   : > { %v1985_v58 = vpop.f32.mrf.mxu2 }
 0x72d   : > { %v1986_v34 = vadd.f32 %v1985_v58, %v1851_v14  ;;  %v3317_v14 = vld [vmem:[%s4655_s3 + $0x1a8] sm:$0xff] }
 0x72f   : > { %v2025_v50 = vmax.f32 %v1986_v34, 0.0  ;;  %v2156_v34 = vpop.permute.xlu1 %2155 }
 0x734   : > { %v1987_v13 = vpop.f32.mrf.mxu2 }
 0x735   : > { %v1988_v21 = vadd.f32 %v1987_v13, %v1856_v44  ;;  %v3318_v44 = vld [vmem:[%s4655_s3 + $0x1b0] sm:$0xff]  ;;  %v2146_v13 = vpop.permute.xlu0 %2145 }
 0x737   : > { %v2026_v5 = vmax.f32 %v1988_v21, 0.0  ;;  %v2151_v21 = vpop.permute.xlu1 %2150 }
 0x739   : > { %v2041_v12 = vpack.c.bf16 %v2026_v5, %v2025_v50  ;;  %v3319_v5 = vld [vmem:[%s4655_s3 + $0x1b8] sm:$0xff] }
 0x73c   : > { %v1990_v36 = vpop.f32.mrf.mxu2 }
 0x73d   : > { %v1991_v31 = vadd.f32 %v1990_v36, %v1861_v0  ;;  %v2141_v50 = vpop.permute.xlu0 %2140 }
 0x73f   : > { %v2027_v45 = vmax.f32 %v1991_v31, 0.0 }
 0x744   : > { %v1992_v19 = vpop.f32.mrf.mxu2 }
 0x745   : > { %v1993_v4 = vadd.f32 %v1992_v19, %v1866_v11  ;;  %v2116_v36 = vpop.permute.xlu0 %2115 }
 0x747   : > { %v2028_v38 = vmax.f32 %v1993_v4, 0.0 }
 0x749   : > { %v2042_v2 = vpack.c.bf16 %v2028_v38, %v2027_v45 }
 0x74c   : > { %v1995_v57 = vpop.f32.mrf.mxu2 }
 0x74d   : > { %v1996_v61 = vadd.f32 %v1995_v57, %v1871_v63  ;;  %v2161_v63 = vpop.permute.xlu2 %2160  ;;  %v2111_v19 = vpop.permute.xlu0 %2110 }
 0x74f   : > { %v2029_v15 = vmax.f32 %v1996_v61, 0.0 }
 0x754   : > { %v1997_v28 = vpop.f32.mrf.mxu2 }
 0x755   : > { %v1998_v29 = vadd.f32 %v1997_v28, %v1876_v54  ;;  %v2136_v11 = vpop.permute.xlu2 %2135 }
 0x757   : > { %v2030_v20 = vmax.f32 %v1998_v29, 0.0 }
 0x759   : > { %v2043_v9 = vpack.c.bf16 %v2030_v20, %v2029_v15 }
 0x75c   : > { %v2000_v35 = vpop.f32.mrf.mxu2 }
 0x75d   : > { %v2001_v8 = vadd.f32 %v2000_v35, %v1881_v40  ;;  %v2131_v38 = vpop.permute.xlu2 %2130 }
 0x75f   : > { %v2031_v7 = vmax.f32 %v2001_v8, 0.0 }
 0x764   : > { %v2002_v48 = vpop.f32.mrf.mxu2 }
 0x765   : > { %v2003_v37 = vadd.f32 %v2002_v48, %v1886_v32  ;;  %v2106_v35 = vpop.permute.xlu2 %2105 }
 0x767   : > { %v2032_v43 = vmax.f32 %v2003_v37, 0.0 }
 0x769   : > { %v2044_v16 = vpack.c.bf16 %v2032_v43, %v2031_v7 }
 0x76c   : > { %v2005_v17 = vpop.f32.mrf.mxu2 }
 0x76d   : > { %v2006_v54 = vadd.f32 %v2005_v17, %v4497_v46  ;;  %v3313_v46 = vld [vmem:[%s4655_s3 + $0x188] sm:$0xff]  ;;  %v2101_v37 = vpop.permute.xlu2 %2100 }
 0x774   : > { %v2007_v1 = vpop.f32.mrf.mxu2 }
 0x775   : > { %v2008_v26 = vadd.f32 %v2007_v1, %v1896_v55  ;;  %v3316_v55 = vld [vmem:[%s4655_s3 + $0x1a0] sm:$0xff] }
 0x77c   : > { %v2010_v30 = vpop.f32.mrf.mxu2 }
 0x77d   : > { %v2011_v6 = vadd.f32 %v2010_v30, %v1901_v47  ;;  %v3315_v47 = vld [vmem:[%s4655_s3 + $0x198] sm:$0xff] }
 0x77f   : > { %v2035_v0 = vmax.f32 %v2011_v6, 0.0 }
 0x784   : > { %v2012_v27 = vpop.f32.mrf.mxu2 }
 0x785   : > { %v2013_v59 = vadd.f32 %v2012_v27, %v1906_v39  ;;  %v3312_v39 = vld [vmem:[%s4655_s3 + $0x180] sm:$0xff] }
 0x787   : > { %v2036_v40 = vmax.f32 %v2013_v59, 0.0 }
 0x789   : > { %v2046_v58 = vpack.c.bf16 %v2036_v40, %v2035_v0 }
 0x78c   : > { %v2015_v53 = vpop.f32.mrf.mxu2 }
 0x78d   : > { %v2016_v24 = vadd.f32 %v2015_v53, %v1911_v41 }
 0x78f   : > { %v2037_v42 = vmax.f32 %v2016_v24, 0.0 }
 0x794   : > { %v2017_v49 = vpop.f32.mrf.mxu2 }
 0x795   : > { %v2018_v52 = vadd.f32 %v2017_v49, %v1916_v22  ;;  %v2033_v22 = vmax.f32 %v2006_v54, 0.0 }
 0x797   : > { %v2038_v62 = vmax.f32 %v2018_v52, 0.0 }
 0x799   : > { %v2047_v32 = vpack.c.bf16 %v2038_v62, %v2037_v42 }
 0x79c   : > { %v2020_v25 = vpop.f32.mrf.mxu2 }
 0x79d   : > { %v2021_v33 = vadd.f32 %v2020_v25, %v1921_v18  ;;  %v2034_v18 = vmax.f32 %v2008_v26, 0.0 }
 0x79f   : > { %v2039_v60 = vmax.f32 %v2021_v33, 0.0  ;;  %v2045_v41 = vpack.c.bf16 %v2034_v18, %v2033_v22 }
 0x7a4   : > { %v2022_v51 = vpop.f32.mrf.mxu2 }
 0x7a5   : > { %v2023_v10 = vadd.f32 %v2022_v51, %v1926_v23  ;;  %v3314_v23 = vld [vmem:[%s4655_s3 + $0x190] sm:$0xff] }
 0x7a7   : > { %v2040_v56 = vmax.f32 %v2023_v10, 0.0 }
 0x7a9   : > { %v2048_v3 = vpack.c.bf16 %v2040_v56, %v2039_v60 }
 0x7ab   : > { %2211 = vmatpush.bf16.msra.mxu3 %v2048_v3 }
 0x7af   : > { %2212 = vmatpush.bf16.msra.mxu3 %v2047_v32 }
 0x7b3   : > { %2213 = vmatpush.bf16.msra.mxu3 %v2046_v58 }
 0x7b7   : > { %2214 = vmatpush.bf16.msra.mxu3 %v2045_v41 }
 0x7bb   : > { %2215 = vmatpush.bf16.msra.mxu3 %v2044_v16 }
 0x7bf   : > { %2216 = vmatpush.bf16.msra.mxu3 %v2043_v9 }
 0x7c3   : > { %2217 = vmatpush.bf16.msra.mxu3 %v2042_v2  ;;  %v2086_v2 = vpop.permute.xlu0 %2085 }
 0x7c7   : > { %2218 = vmatpush.bf16.msra.mxu3 %v2041_v12  ;;  %v4524_v12 = vpop.permute.xlu1 %2125 }
 0x7ca   : > { %2219 = vmatmul.bf16.vlgmr.msra.gmra.mxu3 %v3312_v39 }
 0x7cf   : > { %v2121_v31 = vpop.permute.xlu1 %2120 }
 0x7d7   : > { %v2096_v4 = vpop.permute.xlu1 %2095 }
 0x7da   : > { %2224 = vmatmul.bf16.gmra.mxu3 %v3313_v46 }
 0x7df   : > { %v2091_v61 = vpop.permute.xlu1 %2090 }
 0x7ea   : > { %2229 = vmatmul.bf16.gmra.mxu3 %v3314_v23 }
 0x7fa   : > { %2234 = vmatmul.bf16.gmra.mxu3 %v3315_v47 }
 0x80a   : > { %2239 = vmatmul.bf16.gmra.mxu3 %v3316_v55 }
 0x81a   : > { %2244 = vmatmul.bf16.gmra.mxu3 %v3317_v14 }
 0x82a   : > { %2249 = vmatmul.bf16.gmra.mxu3 %v3318_v44 }
 0x83a   : > { %2254 = vmatmul.bf16.gmra.mxu3 %v3319_v5 }
 0x84d   : > { %v2220_v45 = vpop.f32.mrf.mxu3 }
 0x84e   : > { %v2221_v57 = vadd.f32 %v2220_v45, %v2086_v2  ;;  %v3325_v2 = vld [vmem:[%s4655_s3 + $0x1e8] sm:$0xff] }
 0x850   : > { %v2260_v15 = vmax.f32 %v2221_v57, 0.0  ;;  %v2391_v57 = vpop.permute.xlu2 %2390 }
 0x855   : > { %v2222_v28 = vpop.f32.mrf.mxu3 }
 0x856   : > { %v2223_v29 = vadd.f32 %v2222_v28, %v2091_v61  ;;  %v2381_v61 = vpop.permute.xlu1 %2380  ;;  %v3326_v28 = vld [vmem:[%s4655_s3 + $0x1f0] sm:$0xff] }
 0x858   : > { %v2261_v20 = vmax.f32 %v2223_v29, 0.0  ;;  %v2386_v29 = vpop.permute.xlu2 %2385 }
 0x85a   : > { %v2276_v9 = vpack.c.bf16 %v2261_v20, %v2260_v15 }
 0x85d   : > { %v2225_v8 = vpop.f32.mrf.mxu3 }
 0x85e   : > { %v2226_v48 = vadd.f32 %v2225_v8, %v2096_v4  ;;  %v2376_v15 = vpop.permute.xlu1 %2375 }
 0x860   : > { %v2262_v16 = vmax.f32 %v2226_v48, 0.0  ;;  %v4548_v20 = vpop.permute.xlu2 %2360 }
 0x865   : > { %v2227_v7 = vpop.f32.mrf.mxu3 }
 0x866   : > { %v2228_v43 = vadd.f32 %v2227_v7, %v2101_v37  ;;  %v2351_v8 = vpop.permute.xlu1 %2350 }
 0x868   : > { %v2263_v17 = vmax.f32 %v2228_v43, 0.0  ;;  %v2356_v48 = vpop.permute.xlu2 %2355 }
 0x86a   : > { %v2277_v1 = vpack.c.bf16 %v2263_v17, %v2262_v16 }
 0x86d   : > { %v2230_v30 = vpop.f32.mrf.mxu3 }
 0x86e   : > { %v2231_v27 = vadd.f32 %v2230_v30, %v2106_v35  ;;  %v2396_v35 = vpop.permute.xlu0 %2395  ;;  %v2346_v7 = vpop.permute.xlu1 %2345 }
 0x870   : > { %v2264_v25 = vmax.f32 %v2231_v27, 0.0  ;;  %v2331_v43 = vpop.permute.xlu2 %2330 }
 0x875   : > { %v2232_v53 = vpop.f32.mrf.mxu3 }
 0x876   : > { %v2233_v49 = vadd.f32 %v2232_v53, %v2111_v19  ;;  %v2371_v37 = vpop.permute.xlu0 %2370 }
 0x878   : > { %v2265_v33 = vmax.f32 %v2233_v49, 0.0  ;;  %v2326_v27 = vpop.permute.xlu2 %2325 }
 0x87a   : > { %v2278_v51 = vpack.c.bf16 %v2265_v33, %v2264_v25 }
 0x87d   : > { %v2235_v52 = vpop.f32.mrf.mxu3 }
 0x87e   : > { %v2236_v10 = vadd.f32 %v2235_v52, %v2116_v36  ;;  %v2366_v17 = vpop.permute.xlu0 %2365 }
 0x880   : > { %v2266_v56 = vmax.f32 %v2236_v10, 0.0 }
 0x885   : > { %v2237_v24 = vpop.f32.mrf.mxu3 }
 0x886   : > { %v2238_v60 = vadd.f32 %v2237_v24, %v2121_v31  ;;  %v2341_v52 = vpop.permute.xlu0 %2340 }
 0x888   : > { %v2267_v59 = vmax.f32 %v2238_v60, 0.0 }
 0x88a   : > { %v2279_v62 = vpack.c.bf16 %v2267_v59, %v2266_v56 }
 0x88d   : > { %v2240_v3 = vpop.f32.mrf.mxu3 }
 0x88e   : > { %v2241_v19 = vadd.f32 %v2240_v3, %v4524_v12  ;;  %v3321_v12 = vld [vmem:[%s4655_s3 + $0x1c8] sm:$0xff]  ;;  %v2336_v60 = vpop.permute.xlu0 %2335 }
 0x895   : > { %v2242_v6 = vpop.f32.mrf.mxu3 }
 0x896   : > { %v2243_v5 = vadd.f32 %v2242_v6, %v2131_v38  ;;  %v3324_v38 = vld [vmem:[%s4655_s3 + $0x1e0] sm:$0xff] }
 0x89d   : > { %v2245_v42 = vpop.f32.mrf.mxu3 }
 0x89e   : > { %v2246_v14 = vadd.f32 %v2245_v42, %v2136_v11  ;;  %v3323_v11 = vld [vmem:[%s4655_s3 + $0x1d8] sm:$0xff] }
 0x8a0   : > { %v2270_v4 = vmax.f32 %v2246_v14, 0.0 }
 0x8a5   : > { %v2247_v26 = vpop.f32.mrf.mxu3 }
 0x8a6   : > { %v2248_v23 = vadd.f32 %v2247_v26, %v2141_v50  ;;  %v3320_v50 = vld [vmem:[%s4655_s3 + $0x1c0] sm:$0xff] }
 0x8a8   : > { %v2271_v36 = vmax.f32 %v2248_v23, 0.0 }
 0x8aa   : > { %v2281_v45 = vpack.c.bf16 %v2271_v36, %v2270_v4 }
 0x8ad   : > { %v2250_v40 = vpop.f32.mrf.mxu3 }
 0x8ae   : > { %v2251_v41 = vadd.f32 %v2250_v40, %v2146_v13 }
 0x8b0   : > { %v2272_v44 = vmax.f32 %v2251_v41, 0.0 }
 0x8b5   : > { %v2252_v32 = vpop.f32.mrf.mxu3 }
 0x8b6   : > { %v2253_v58 = vadd.f32 %v2252_v32, %v2151_v21  ;;  %v2268_v21 = vmax.f32 %v2241_v19, 0.0 }
 0x8b8   : > { %v2273_v47 = vmax.f32 %v2253_v58, 0.0 }
 0x8ba   : > { %v2282_v31 = vpack.c.bf16 %v2273_v47, %v2272_v44 }
 0x8bd   : > { %v2255_v54 = vpop.f32.mrf.mxu3 }
 0x8be   : > { %v2256_v0 = vadd.f32 %v2255_v54, %v2156_v34  ;;  %v2269_v34 = vmax.f32 %v2243_v5, 0.0 }
 0x8c0   : > { %v2274_v39 = vmax.f32 %v2256_v0, 0.0  ;;  %v2280_v13 = vpack.c.bf16 %v2269_v34, %v2268_v21 }
 0x8c5   : > { %v2257_v18 = vpop.f32.mrf.mxu3 }
 0x8c6   : > { %v2258_v22 = vadd.f32 %v2257_v18, %v2161_v63  ;;  %v3322_v63 = vld [vmem:[%s4655_s3 + $0x1d0] sm:$0xff] }
 0x8c8   : > { %v2275_v46 = vmax.f32 %v2258_v22, 0.0 }
 0x8ca   : > { %v2283_v55 = vpack.c.bf16 %v2275_v46, %v2274_v39 }
 0x8cc   : > { %2446 = vmatpush.bf16.msra.mxu0 %v2283_v55 }
 0x8d0   : > { %2447 = vmatpush.bf16.msra.mxu0 %v2282_v31 }
 0x8d4   : > { %2448 = vmatpush.bf16.msra.mxu0 %v2281_v45 }
 0x8d8   : > { %2449 = vmatpush.bf16.msra.mxu0 %v2280_v13 }
 0x8dc   : > { %2450 = vmatpush.bf16.msra.mxu0 %v2279_v62 }
 0x8e0   : > { %2451 = vmatpush.bf16.msra.mxu0 %v2278_v51 }
 0x8e4   : > { %2452 = vmatpush.bf16.msra.mxu0 %v2277_v1  ;;  %v2321_v1 = vpop.permute.xlu1 %2320 }
 0x8e8   : > { %2453 = vmatpush.bf16.msra.mxu0 %v2276_v9  ;;  %v3327_v9 = vld [vmem:[%s4655_s3 + $0x1f8] sm:$0xff]  ;;  %s3429_s3 = scalar_lea.hbm %s3428_s2, 128 }
 0x8e9   : > { %p3430_p1 = scmp.ne.s32.totalorder %s3428_s2, %s3429_s3  ;;  %p3435_p5 = scmp.lt.s32.totalorder %s3433_s0, %s3429_s3 }
 0x8eb   : > { %2454 = vmatmul.bf16.vlgmr.msra.gmra.mxu0 %v3320_v50  ;;  %p3431_p2 = pnand %p3430_p1, %p3650_p8  ;;  %p3436_p6 = por %p3435_p5, %p3434_p4 }
 0x8ed   : > { %p3432_p3 = pneg %p3431_p2 }
 0x8ef   : > { %p3437_p7 = pnand %p3436_p6, %p3432_p3 }
 0x8fb   : > { %2459 = vmatmul.bf16.gmra.mxu0 %v3321_v12 }
 0x90b   : > { %2464 = vmatmul.bf16.gmra.mxu0 %v3322_v63 }
 0x91b   : > { %2469 = vmatmul.bf16.gmra.mxu0 %v3323_v11 }
 0x92b   : > { %2474 = vmatmul.bf16.gmra.mxu0 %v3324_v38 }
 0x93b   : > { %2479 = vmatmul.bf16.gmra.mxu0 %v3325_v2 }
 0x94b   : > { %2484 = vmatmul.bf16.gmra.mxu0 %v3326_v28 }
 0x95b   : > { %2489 = vmatmul.bf16.gmra.mxu0 %v3327_v9 }
 0x968   : > { %v2455_v16 = vpop.f32.mrf.mxu0 }
 0x969   : > { %v2456_v30 = vadd.f32 %v2455_v16, %v2321_v1 }
 0x96b   : > { %v2495_v25 = vmax.f32 %v2456_v30, 0.0 }
 0x970   : > { %v2457_v53 = vpop.f32.mrf.mxu0 }
 0x971   : > { %v2458_v49 = vadd.f32 %v2457_v53, %v2326_v27 }
 0x973   : > { %v2496_v33 = vmax.f32 %v2458_v49, 0.0 }
 0x975   : > { %v2511_v51 = vpack.c.bf16 %v2496_v33, %v2495_v25 }
 0x978   : > { %v2460_v10 = vpop.f32.mrf.mxu0 }
 0x979   : > { %v2461_v24 = vadd.f32 %v2460_v10, %v2331_v43 }
 0x97b   : > { %v2497_v62 = vmax.f32 %v2461_v24, 0.0 }
 0x980   : > { %v2462_v56 = vpop.f32.mrf.mxu0 }
 0x981   : > { %v2463_v59 = vadd.f32 %v2462_v56, %v2336_v60 }
 0x983   : > { %v2498_v3 = vmax.f32 %v2463_v59, 0.0 }
 0x985   : > { %v2512_v6 = vpack.c.bf16 %v2498_v3, %v2497_v62 }
 0x988   : > { %v2465_v42 = vpop.f32.mrf.mxu0 }
 0x989   : > { %v2466_v26 = vadd.f32 %v2465_v42, %v2341_v52 }
 0x98b   : > { %v2499_v54 = vmax.f32 %v2466_v26, 0.0 }
 0x990   : > { %v2467_v40 = vpop.f32.mrf.mxu0 }
 0x991   : > { %v2468_v32 = vadd.f32 %v2467_v40, %v2346_v7 }
 0x993   : > { %v2500_v0 = vmax.f32 %v2468_v32, 0.0 }
 0x995   : > { %v2513_v18 = vpack.c.bf16 %v2500_v0, %v2499_v54 }
 0x998   : > { %v2470_v58 = vpop.f32.mrf.mxu0 }
 0x999   : > { %v2471_v22 = vadd.f32 %v2470_v58, %v2351_v8 }
 0x99b   : > { %v2501_v46 = vmax.f32 %v2471_v22, 0.0 }
 0x9a0   : > { %v2472_v41 = vpop.f32.mrf.mxu0 }
 0x9a1   : > { %v2473_v39 = vadd.f32 %v2472_v41, %v2356_v48 }
 0x9a3   : > { %v2502_v23 = vmax.f32 %v2473_v39, 0.0 }
 0x9a5   : > { %v2514_v47 = vpack.c.bf16 %v2502_v23, %v2501_v46 }
 0x9a8   : > { %v2475_v55 = vpop.f32.mrf.mxu0 }
 0x9a9   : > { %v2476_v7 = vadd.f32 %v2475_v55, %v4548_v20  ;;  %v2519_v20 = vld [vmem:[%s4666_s5] sm:$0x1] }
 0x9b0   : > { %v2477_v14 = vpop.f32.mrf.mxu0 }
 0x9b1   : > { %v2478_v9 = vadd.f32 %v2477_v14, %v2366_v17 }
 0x9b8   : > { %v2480_v44 = vpop.f32.mrf.mxu0 }
 0x9b9   : > { %v2481_v2 = vadd.f32 %v2480_v44, %v2371_v37 }
 0x9c0   : > { %v2482_v5 = vpop.f32.mrf.mxu0 }
 0x9c1   : > { %v2483_v63 = vadd.f32 %v2482_v5, %v2376_v15 }
 0x9c3   : > { %v2506_v8 = vmax.f32 %v2483_v63, 0.0 }
 0x9c8   : > { %v2485_v36 = vpop.f32.mrf.mxu0 }
 0x9c9   : > { %v2486_v13 = vadd.f32 %v2485_v36, %v2381_v61 }
 0x9cb   : > { %v2507_v28 = vmax.f32 %v2486_v13, 0.0 }
 0x9d0   : > { %v2487_v31 = vpop.f32.mrf.mxu0 }
 0x9d1   : > { %v2488_v45 = vadd.f32 %v2487_v31, %v2386_v29  ;;  %v2504_v29 = vmax.f32 %v2478_v9, 0.0 }
 0x9d3   : > { %v2508_v11 = vmax.f32 %v2488_v45, 0.0 }
 0x9d5   : > { %v2517_v48 = vpack.c.bf16 %v2508_v11, %v2507_v28 }
 0x9d8   : > { %v2490_v19 = vpop.f32.mrf.mxu0 }
 0x9d9   : > { %v2491_v4 = vadd.f32 %v2490_v19, %v2391_v57  ;;  %v2505_v57 = vmax.f32 %v2481_v2, 0.0 }
 0x9db   : > { %v2509_v50 = vmax.f32 %v2491_v4, 0.0  ;;  %v2516_v61 = vpack.c.bf16 %v2506_v8, %v2505_v57 }
 0x9e0   : > { %v2492_v34 = vpop.f32.mrf.mxu0 }
 0x9e1   : > { %v2493_v21 = vadd.f32 %v2492_v34, %v2396_v35  ;;  %v2503_v35 = vmax.f32 %v2476_v7, 0.0 }
 0x9e3   : > { %v2510_v12 = vmax.f32 %v2493_v21, 0.0  ;;  %v2515_v15 = vpack.c.bf16 %v2504_v29, %v2503_v35 }
 0x9e5   : > { %v2518_v38 = vpack.c.bf16 %v2510_v12, %v2509_v50 }
 0x9e7   : > { %2526 = vmatpush.bf16.msra.mxu1 %v2518_v38 }
 0x9eb   : > { %2527 = vmatpush.bf16.msra.mxu1 %v2517_v48 }
 0x9ef   : > { %2528 = vmatpush.bf16.msra.mxu1 %v2516_v61 }
 0x9f3   : > { %2529 = vmatpush.bf16.msra.mxu1 %v2515_v15 }
 0x9f7   : > { %2530 = vmatpush.bf16.msra.mxu1 %v2514_v47 }
 0x9fb   : > { %2531 = vmatpush.bf16.msra.mxu1 %v2513_v18 }
 0x9ff   : > { %2532 = vmatpush.bf16.msra.mxu1 %v2512_v6 }
 0xa03   : > { %2533 = vmatpush.bf16.msra.mxu1 %v2511_v51 }
 0xa06   : > { %2534 = vmatmul.bf16.vlgmr.msra.gmra.mxu1 %v2519_v20 }
 0xa07   : > { %3440 = shalt.err (!%p3437_p7)
}
 0xa08   : > { %s3542_s15 = smov 128   ;;  %s3543_s23 = smov 256   ;;  %v2524_v37 = vpop.permute.xlu0 %2523 }
 0xa09   : > { %s3544_s16 = smov 8   ;;  %s3249_s25 = sshll.u32 %s3527_s9, 1 }
 0xa0a   : > { %3331 = dma.vmem_to_hbm [thread:$0]  (%p3650_p8), %s2592_s14, 2048, %s2594_s17, %s2562_s1, %s3542_s15, %s3543_s23, %s3544_s16  }
 0xa0b   : > { %s2572_s26 = sadd.s32 %s3523_s30, %s3249_s25  ;;  %s2721_s22 = sshll.u32 %s3685_s13, 1 }
 0xa0c   : > { %s3250_s21 = sshll.u32 %s2572_s26, 1  ;;  %s374_s0 = scalar_lea.vmem [#allocation3], %s2721_s22 }
 0xa0d   : > { %s2574_s3 = scalar_lea.hbm %s4626_s7, %s3250_s21  ;;  %s2576_s18 = sshll.u32 %s374_s0, 4  ;;  %s2577_s18 = int_to_ptr.vmem [resolvable:$true] %s2576_s18 }
 0xa0e   : > { %s2578_s5 = sshll.u32 %s2574_s3, 4  ;;  %s2557_s6 = scalar_lea.sflag [#allocation4], %s3685_s13  ;;  %s2579_s5 = int_to_ptr.hbm [resolvable:$true] %s2578_s5 }
 0xa0f   : > { %s3455_s1 = sshra.s32 %s2579_s5, 4  ;;  %s3461_s17 = scalar_lea.hbm %s4626_s7, 8  ;;  %s3456_s1 = int_to_ptr.hbm [resolvable:$true] %s3455_s1 }
 0xa10   : > { %s3457_s30 = scalar_lea.hbm %s3456_s1, 2  ;;  %p3462_p13 = scmp.lt.s32.totalorder %s3456_s1, %s4626_s7 }
 0xa11   : > { %p3458_p10 = scmp.ne.s32.totalorder %s3456_s1, %s3457_s30  ;;  %p3463_p0 = scmp.lt.s32.totalorder %s3461_s17, %s3457_s30 }
 0xa13   : > { %p3459_p11 = pnand %p3458_p10, %p3650_p8  ;;  %p3464_p1 = por %p3463_p0, %p3462_p13 }
 0xa15   : > { %p3460_p12 = pneg %p3459_p11 }
 0xa17   : > { %p3465_p2 = pnand %p3464_p1, %p3460_p12 }
 0xa83   : > { %v2535_v43 = vpop.f32.mrf.mxu1 }
 0xa84   : > { %v2536_v16 = vadd.f32 %v2535_v43, %v2524_v37 }
 0xa86   : > { %2555 = vst [vmem:[%s374_s0] sm:$0x3] %v2536_v16 }
 0xa87   : > { %3468 = shalt.err (!%p3465_p2)
}
 0xa88   : > { %3330 = dma.vmem_to_hbm [thread:$0]  (%p3650_p8), %s2577_s18, 32, %s2579_s5, %s2557_s6  }
 0xa8b   : > { %v2537_v17 = vpop.f32.mrf.mxu1 }
 0xa8c PF: > { %p3341_p3 = scmp.ge.s32.totalorder %s3539_s12, 2  ;;  %s2608_s13 = sand.u32 1, %s3511_s27  }
 0xa8d   : > { %s2609_s16 = scalar_lea.sflag [#allocation4], %s2608_s13 }
 0xa8e   : > { %p3335_p4 = pnand %p3341_p3, %p3654_p9 }
 0xa90   : > { %p3336_p5 = pneg %p3335_p4 }
 0xa92   : > { %3502 = dma.done.wait (%p3336_p5), %s2609_s16, 32  }
 0xa93   : > { %3504 = vsyncadd (%p3336_p5), %s2609_s16, 4294967264  ;;  %s2619_s25 = scalar_lea.sflag [#allocation6], %s2608_s13 }
 0xa94   : > { %3506 = dma.done.wait (%p3336_p5), %s2619_s25, 2048  }
 0xa95   : > { %3508 = vsyncadd (%p3336_p5), %s2619_s25, 4294965248  ;;  %s25_s12 = sadd.s32 1, %s3539_s12   ;;  %s4667_s5 = sld [smem:[#allocation9_spill]] }
 0xa96   : > { %p22_p6 = scmp.ge.s32.totalorder %s25_s12, 6   ;;  %s4668_s6 = sld [smem:[#allocation10_spill]] }
 0xa97   : > { %s4669_s27 = smov %s3515_s28  ;;  %s4670_s28 = smov %s3519_s29 }
 0xa98   : > { %s4671_s29 = smov %s3662_s24  ;;  %s4672_s30 = smov %s3531_s10 }
 0xa99   : > { %s4673_s9 = smov %s3535_s11  ;;  %24 = sbr.rel (!%p22_p6) target bundleno = 15 (0xf), region = 160 }
 0xa9b   : > { %s4674_s10 = smov %s4667_s5 }
 0xa9c   : > { %s4675_s11 = smov %s4668_s6 }
 0xa9e   :  { %2625 = vsyncpa [#allocation4], 1 }
 0xa9f   :  { %2627 = vsyncpa [#allocation4 + $0x1], 1 }
 0xaa0   :  { %2628 = vsyncpa [#allocation6], 1 }
 0xaa1   :  { %2630 = vsyncpa [#allocation6 + $0x1], 1 }

</bundles_post_ra>
